<compile_context>
chip_gen: v7x
topology: tpu7x:2x2x1
jax: 0.10.0
libtpu: 0.0.40
codegen_flags: <defaults>
</compile_context>

<pallas_src>
import functools

import jax
import jax.numpy as jnp
from jax import lax
from jax.experimental import pallas as pl
from jax.experimental.pallas import tpu as pltpu


def cbow_kernel(idx_ref,      # VMEM (TILE_B, C) int32  context ids for this batch tile
                t_ref,        # VMEM (C, V, H)  f32     pre-fused per-slot tables emb @ W1[c]
                b1_ref,       # VMEM (1, H)
                w2_ref,       # VMEM (H, V)
                b2_ref,       # VMEM (1, V)
                out_ref,      # VMEM (TILE_B, V)        log-probabilities for this tile
                *, context_size, matmul_dtype):
    tile_b = idx_ref.shape[0]
    vocab = t_ref.shape[1]
    hidden = t_ref.shape[2]

    # Clamp untrusted ids once, vectorized (semantic difference vs. PyTorch: OOB
    # ids map to a valid row instead of raising).
    idx = jnp.clip(idx_ref[...], 0, vocab - 1)                     # (TILE_B, C)

    # ---- Embedding gather fused with linear1 as one-hot MXU matmuls:
    #      h = relu(b1 + sum_c one_hot(idx[:, c]) @ T[c])
    iota_v = lax.broadcasted_iota(jnp.int32, (tile_b, vocab), 1)   # built once
    acc = jnp.zeros((tile_b, hidden), jnp.float32)
    for c in range(context_size):                                  # static, C is small
        one_hot = (idx[:, c:c + 1] == iota_v).astype(matmul_dtype)           # (TILE_B, V)
        acc = acc + jnp.dot(one_hot, t_ref[c].astype(matmul_dtype),
                            preferred_element_type=jnp.float32)              # (TILE_B, H)
    h = jnp.maximum(acc + b1_ref[...], 0.0)                        # relu, f32

    # ---- linear2
    logits = (jnp.dot(h.astype(matmul_dtype), w2_ref[...].astype(matmul_dtype),
                      preferred_element_type=jnp.float32)
              + b2_ref[...])                                        # (TILE_B, V)

    # ---- log_softmax over the vocab axis (PyTorch implicit dim=1 for 2-D input)
    m = jnp.max(logits, axis=-1, keepdims=True)
    shifted = logits - m
    lse = jnp.log(jnp.sum(jnp.exp(shifted), axis=-1, keepdims=True))
    out_ref[...] = shifted - lse


def cbow_forward(indices, emb_table, w1_t, b1, w2_t, b2, *,
                 tile_b=128, matmul_dtype=jnp.float32):
    """Batched CBOW forward.

    indices  : (B, context_size) int32 context-word ids
    emb_table: (V, E) f32
    w1_t     : (context_size*E, H) f32  == PyTorch linear1.weight.T
               Rows MUST be ordered context-major then embedding-dim, matching
               embeds.view(1, -1) in the reference module (cannot be checked from
               shapes alone).
    b1       : (1, H) f32
    w2_t     : (H, V) f32               == PyTorch linear2.weight.T
    b2       : (1, V) f32
    returns  : (B, V) f32 log-probabilities; row i equals the module's
               forward(indices[i]).
    """
    B, context_size = indices.shape
    vocab_size, embedding_dim = emb_table.shape
    hidden = w1_t.shape[-1]
    assert w1_t.shape == (context_size * embedding_dim, hidden), w1_t.shape
    assert b1.shape == (1, hidden), b1.shape
    assert w2_t.shape == (hidden, vocab_size), w2_t.shape
    assert b2.shape == (1, vocab_size), b2.shape

    tile_b = min(tile_b, B)
    assert B % tile_b == 0, "batch must be divisible by the batch tile"
    n_b = B // tile_b

    # Pre-fuse the embedding table with linear1 per context slot:
    #   T[c] = emb_table @ w1_t[c*E:(c+1)*E, :]   ->  (C, V, H)
    # Done once per call with plain XLA; HIGHEST precision so the fused path
    # matches the f32 reference numerics.
    t_fused = jnp.einsum(
        've,ceh->cvh', emb_table,
        w1_t.reshape(context_size, embedding_dim, hidden),
        precision=lax.Precision.HIGHEST)

    kernel = functools.partial(cbow_kernel,
                               context_size=context_size,
                               matmul_dtype=matmul_dtype)

    grid_spec = pltpu.PrefetchScalarGridSpec(
        num_scalar_prefetch=0,
        grid=(n_b,),
        in_specs=[
            # per-tile batch of context ids
            pl.BlockSpec((tile_b, context_size), lambda b: (b, 0)),
            # Constant index_maps -> fused tables & weights fetched once,
            # VMEM-resident across all batch tiles.
            pl.BlockSpec((context_size, vocab_size, hidden), lambda b: (0, 0, 0)),
            pl.BlockSpec((1, hidden), lambda b: (0, 0)),
            pl.BlockSpec((hidden, vocab_size), lambda b: (0, 0)),
            pl.BlockSpec((1, vocab_size), lambda b: (0, 0)),
        ],
        out_specs=pl.BlockSpec((tile_b, vocab_size), lambda b: (b, 0)),
    )

    # one-hot gather matmuls (C per tile) + linear2
    flops = 2 * B * (context_size * vocab_size * hidden + hidden * vocab_size)
    bytes_accessed = 4 * (B * context_size                          # ids
                          + context_size * vocab_size * hidden      # fused tables
                          + hidden                                  # b1
                          + hidden * vocab_size + vocab_size        # w2, b2
                          + B * vocab_size)                         # output
    cost = pl.CostEstimate(flops=flops,
                           transcendentals=B * (vocab_size + 1),
                           bytes_accessed=bytes_accessed)

    return pl.pallas_call(
        kernel,
        out_shape=jax.ShapeDtypeStruct((B, vocab_size), jnp.float32),
        grid_spec=grid_spec,
        compiler_params=pltpu.CompilerParams(
            dimension_semantics=("parallel",)),
        cost_estimate=cost,
    )(indices.astype(jnp.int32), t_fused, b1, w2_t, b2)


if __name__ == "__main__":
    # Small shapes consistent with the module (hidden=128 is hard-coded there).
    vocab_size, embedding_dim, context_size, hidden = 256, 32, 4, 128
    B = 512          # batch of independent CBOW examples, tiled 128 rows per grid step

    key = jax.random.PRNGKey(0)
    k_idx, k_emb, k_w1, k_b1, k_w2, k_b2 = jax.random.split(key, 6)

    indices = jax.random.randint(k_idx, (B, context_size), 0, vocab_size,
                                 dtype=jnp.int32)
    emb_table = 0.1 * jax.random.normal(k_emb, (vocab_size, embedding_dim),
                                        jnp.float32)
    # nn.Linear weights stored transposed (input-major) so y = x @ W + b.
    w1_t = 0.1 * jax.random.normal(k_w1, (context_size * embedding_dim, hidden),
                                   jnp.float32)
    b1 = 0.1 * jax.random.normal(k_b1, (1, hidden), jnp.float32)
    w2_t = 0.1 * jax.random.normal(k_w2, (hidden, vocab_size), jnp.float32)
    b2 = 0.1 * jax.random.normal(k_b2, (1, vocab_size), jnp.float32)

    log_probs = jax.block_until_ready(
        cbow_forward(indices, emb_table, w1_t, b1, w2_t, b2))

    # pure-JAX reference, mirroring the PyTorch module exactly
    # (flatten order identical to embeds.view(1, -1))
    embeds = emb_table[indices.reshape(-1)].reshape(
        B, context_size * embedding_dim)
    h_ref = jnp.maximum(embeds @ w1_t + b1, 0.0)
    logits_ref = h_ref @ w2_t + b2
    ref = jax.nn.log_softmax(logits_ref, axis=-1)

    assert log_probs.shape == (B, vocab_size)
    assert jnp.allclose(log_probs, ref, atol=1e-4, rtol=1e-4), (
        float(jnp.max(jnp.abs(log_probs - ref))))
    print("KERNEL_OK")
</pallas_src>

<mosaic_0001>
module attributes {stable_mosaic.version = 11 : i64} {
  func.func @cbow_kernel(%arg0: i32, %arg1: memref<128x4xi32, #tpu.memory_space<vmem>>, %arg2: memref<4x256x128xf32, #tpu.memory_space<vmem>>, %arg3: memref<1x128xf32, #tpu.memory_space<vmem>>, %arg4: memref<128x256xf32, #tpu.memory_space<vmem>>, %arg5: memref<1x256xf32, #tpu.memory_space<vmem>>, %arg6: memref<128x256xf32, #tpu.memory_space<vmem>>) attributes {dimension_semantics = [#tpu.dimension_semantics<parallel>], iteration_bounds = array<i64: 4>, scalar_prefetch = 0 : i64, scratch_operands = 0 : i64, tpu.core_type = #tpu.core_type<tc>, window_params = [{transform_indices = @transform_0, window_bounds = array<i64: 128, 4>}, {pipeline_mode = #tpu.pipeline_mode<synchronous>, transform_indices = @transform_1, window_bounds = array<i64: 4, 256, 128>}, {pipeline_mode = #tpu.pipeline_mode<synchronous>, transform_indices = @transform_2, window_bounds = array<i64: 1, 128>}, {pipeline_mode = #tpu.pipeline_mode<synchronous>, transform_indices = @transform_3, window_bounds = array<i64: 128, 256>}, {pipeline_mode = #tpu.pipeline_mode<synchronous>, transform_indices = @transform_4, window_bounds = array<i64: 1, 256>}, {transform_indices = @transform_5, window_bounds = array<i64: 128, 256>}]} {
    %c0 = arith.constant 0 : index
    %c0_0 = arith.constant 0 : index
    %0 = vector.load %arg1[%c0, %c0_0] : memref<128x4xi32, #tpu.memory_space<vmem>>, vector<128x4xi32>
    %c0_i32 = arith.constant 0 : i32
    %c255_i32 = arith.constant 255 : i32
    %1 = vector.broadcast %c0_i32 : i32 to vector<128x4xi32>
    %2 = arith.maxsi %1, %0 : vector<128x4xi32>
    %3 = vector.broadcast %c255_i32 : i32 to vector<128x4xi32>
    %4 = arith.minsi %3, %2 : vector<128x4xi32>
    %5 = tpu.iota {dimensions = array<i32: 1>} : vector<128x256xi32>
    %cst = arith.constant 0.000000e+00 : f32
    %6 = vector.broadcast %cst : f32 to vector<128x128xf32>
    %7 = vector.extract_strided_slice %4 {offsets = [0, 0], sizes = [128, 1], strides = [1, 1]} : vector<128x4xi32> to vector<128x1xi32>
    %8 = vector.broadcast %7 : vector<128x1xi32> to vector<128x256xi32>
    %9 = arith.cmpi eq, %8, %5 : vector<128x256xi32>
    %10 = arith.extui %9 : vector<128x256xi1> to vector<128x256xi32>
    %11 = arith.sitofp %10 : vector<128x256xi32> to vector<128x256xf32>
    %c0_1 = arith.constant 0 : index
    %c0_2 = arith.constant 0 : index
    %c0_3 = arith.constant 0 : index
    %12 = vector.load %arg2[%c0_1, %c0_2, %c0_3] : memref<4x256x128xf32, #tpu.memory_space<vmem>>, vector<1x256x128xf32>
    %13 = vector.shape_cast %12 : vector<1x256x128xf32> to vector<256x128xf32>
    %cst_4 = arith.constant dense<0.000000e+00> : vector<128x128xf32>
    %14 = tpu.matmul %11, %13, %cst_4 {dimension_numbers = #tpu.dot_dimension_numbers<[1], [0], [0], [1], [0, 0, 1, 1], [], []>} : vector<128x256xf32>, vector<256x128xf32>, vector<128x128xf32> -> vector<128x128xf32>
    %15 = arith.addf %6, %14 : vector<128x128xf32>
    %16 = vector.extract_strided_slice %4 {offsets = [0, 1], sizes = [128, 1], strides = [1, 1]} : vector<128x4xi32> to vector<128x1xi32>
    %17 = vector.broadcast %16 : vector<128x1xi32> to vector<128x256xi32>
    %18 = arith.cmpi eq, %17, %5 : vector<128x256xi32>
    %19 = arith.extui %18 : vector<128x256xi1> to vector<128x256xi32>
    %20 = arith.sitofp %19 : vector<128x256xi32> to vector<128x256xf32>
    %c1 = arith.constant 1 : index
    %c0_5 = arith.constant 0 : index
    %c0_6 = arith.constant 0 : index
    %21 = vector.load %arg2[%c1, %c0_5, %c0_6] : memref<4x256x128xf32, #tpu.memory_space<vmem>>, vector<1x256x128xf32>
    %22 = vector.shape_cast %21 : vector<1x256x128xf32> to vector<256x128xf32>
    %cst_7 = arith.constant dense<0.000000e+00> : vector<128x128xf32>
    %23 = tpu.matmul %20, %22, %cst_7 {dimension_numbers = #tpu.dot_dimension_numbers<[1], [0], [0], [1], [0, 0, 1, 1], [], []>} : vector<128x256xf32>, vector<256x128xf32>, vector<128x128xf32> -> vector<128x128xf32>
    %24 = arith.addf %15, %23 : vector<128x128xf32>
    %25 = vector.extract_strided_slice %4 {offsets = [0, 2], sizes = [128, 1], strides = [1, 1]} : vector<128x4xi32> to vector<128x1xi32>
    %26 = vector.broadcast %25 : vector<128x1xi32> to vector<128x256xi32>
    %27 = arith.cmpi eq, %26, %5 : vector<128x256xi32>
    %28 = arith.extui %27 : vector<128x256xi1> to vector<128x256xi32>
    %29 = arith.sitofp %28 : vector<128x256xi32> to vector<128x256xf32>
    %c2 = arith.constant 2 : index
    %c0_8 = arith.constant 0 : index
    %c0_9 = arith.constant 0 : index
    %30 = vector.load %arg2[%c2, %c0_8, %c0_9] : memref<4x256x128xf32, #tpu.memory_space<vmem>>, vector<1x256x128xf32>
    %31 = vector.shape_cast %30 : vector<1x256x128xf32> to vector<256x128xf32>
    %cst_10 = arith.constant dense<0.000000e+00> : vector<128x128xf32>
    %32 = tpu.matmul %29, %31, %cst_10 {dimension_numbers = #tpu.dot_dimension_numbers<[1], [0], [0], [1], [0, 0, 1, 1], [], []>} : vector<128x256xf32>, vector<256x128xf32>, vector<128x128xf32> -> vector<128x128xf32>
    %33 = arith.addf %24, %32 : vector<128x128xf32>
    %34 = vector.extract_strided_slice %4 {offsets = [0, 3], sizes = [128, 1], strides = [1, 1]} : vector<128x4xi32> to vector<128x1xi32>
    %35 = vector.broadcast %34 : vector<128x1xi32> to vector<128x256xi32>
    %36 = arith.cmpi eq, %35, %5 : vector<128x256xi32>
    %37 = arith.extui %36 : vector<128x256xi1> to vector<128x256xi32>
    %38 = arith.sitofp %37 : vector<128x256xi32> to vector<128x256xf32>
    %c3 = arith.constant 3 : index
    %c0_11 = arith.constant 0 : index
    %c0_12 = arith.constant 0 : index
    %39 = vector.load %arg2[%c3, %c0_11, %c0_12] : memref<4x256x128xf32, #tpu.memory_space<vmem>>, vector<1x256x128xf32>
    %40 = vector.shape_cast %39 : vector<1x256x128xf32> to vector<256x128xf32>
    %cst_13 = arith.constant dense<0.000000e+00> : vector<128x128xf32>
    %41 = tpu.matmul %38, %40, %cst_13 {dimension_numbers = #tpu.dot_dimension_numbers<[1], [0], [0], [1], [0, 0, 1, 1], [], []>} : vector<128x256xf32>, vector<256x128xf32>, vector<128x128xf32> -> vector<128x128xf32>
    %42 = arith.addf %33, %41 : vector<128x128xf32>
    %c0_14 = arith.constant 0 : index
    %c0_15 = arith.constant 0 : index
    %43 = vector.load %arg3[%c0_14, %c0_15] : memref<1x128xf32, #tpu.memory_space<vmem>>, vector<1x128xf32>
    %44 = vector.broadcast %43 : vector<1x128xf32> to vector<128x128xf32>
    %45 = arith.addf %42, %44 : vector<128x128xf32>
    %cst_16 = arith.constant 0.000000e+00 : f32
    %46 = vector.broadcast %cst_16 : f32 to vector<128x128xf32>
    %47 = arith.maximumf %45, %46 : vector<128x128xf32>
    %c0_17 = arith.constant 0 : index
    %c0_18 = arith.constant 0 : index
    %48 = vector.load %arg4[%c0_17, %c0_18] : memref<128x256xf32, #tpu.memory_space<vmem>>, vector<128x256xf32>
    %cst_19 = arith.constant dense<0.000000e+00> : vector<128x256xf32>
    %49 = tpu.matmul %47, %48, %cst_19 {dimension_numbers = #tpu.dot_dimension_numbers<[1], [0], [0], [1], [0, 0, 1, 1], [], []>} : vector<128x128xf32>, vector<128x256xf32>, vector<128x256xf32> -> vector<128x256xf32>
    %c0_20 = arith.constant 0 : index
    %c0_21 = arith.constant 0 : index
    %50 = vector.load %arg5[%c0_20, %c0_21] : memref<1x256xf32, #tpu.memory_space<vmem>>, vector<1x256xf32>
    %51 = vector.broadcast %50 : vector<1x256xf32> to vector<128x256xf32>
    %52 = arith.addf %49, %51 : vector<128x256xf32>
    %cst_22 = arith.constant dense<0xFF800000> : vector<128xf32>
    %53 = vector.multi_reduction <maximumf>, %52, %cst_22 [1] : vector<128x256xf32> to vector<128xf32>
    %54 = vector.shape_cast %53 : vector<128xf32> to vector<128x1xf32>
    %55 = vector.broadcast %54 : vector<128x1xf32> to vector<128x256xf32>
    %56 = arith.subf %52, %55 : vector<128x256xf32>
    %57 = math.exp %56 : vector<128x256xf32>
    %cst_23 = arith.constant dense<0.000000e+00> : vector<128xf32>
    %58 = vector.multi_reduction <add>, %57, %cst_23 [1] : vector<128x256xf32> to vector<128xf32>
    %59 = vector.shape_cast %58 : vector<128xf32> to vector<128x1xf32>
    %60 = math.log %59 : vector<128x1xf32>
    %61 = vector.broadcast %60 : vector<128x1xf32> to vector<128x256xf32>
    %62 = arith.subf %56, %61 : vector<128x256xf32>
    %c0_24 = arith.constant 0 : index
    %c0_25 = arith.constant 0 : index
    %63 = vector.load %arg6[%c0_24, %c0_25] : memref<128x256xf32, #tpu.memory_space<vmem>>, vector<128x256xf32>
    tpu.vector_store %arg6[%c0_24, %c0_25], %62 {strides = array<i32>} : memref<128x256xf32, #tpu.memory_space<vmem>>, vector<128x256xf32>,
    return
  }
  func.func @transform_0(%arg0: i32) -> (i32, i32) {
    %c0_i32 = arith.constant 0 : i32
    %c0_i32_0 = arith.constant 0 : i32
    return %arg0, %c0_i32 : i32, i32
  }
  func.func @transform_1(%arg0: i32) -> (i32, i32, i32) {
    %c0_i32 = arith.constant 0 : i32
    %c0_i32_0 = arith.constant 0 : i32
    %c0_i32_1 = arith.constant 0 : i32
    %c0_i32_2 = arith.constant 0 : i32
    return %c0_i32, %c0_i32_0, %c0_i32_1 : i32, i32, i32
  }
  func.func @transform_2(%arg0: i32) -> (i32, i32) {
    %c0_i32 = arith.constant 0 : i32
    %c0_i32_0 = arith.constant 0 : i32
    %c0_i32_1 = arith.constant 0 : i32
    return %c0_i32, %c0_i32_0 : i32, i32
  }
  func.func @transform_3(%arg0: i32) -> (i32, i32) {
    %c0_i32 = arith.constant 0 : i32
    %c0_i32_0 = arith.constant 0 : i32
    %c0_i32_1 = arith.constant 0 : i32
    return %c0_i32, %c0_i32_0 : i32, i32
  }
  func.func @transform_4(%arg0: i32) -> (i32, i32) {
    %c0_i32 = arith.constant 0 : i32
    %c0_i32_0 = arith.constant 0 : i32
    %c0_i32_1 = arith.constant 0 : i32
    return %c0_i32, %c0_i32_0 : i32, i32
  }
  func.func @transform_5(%arg0: i32) -> (i32, i32) {
    %c0_i32 = arith.constant 0 : i32
    %c0_i32_0 = arith.constant 0 : i32
    return %arg0, %c0_i32 : i32, i32
  }
}

</mosaic_0001>

<bundles_post_ra>
// kernel: tpu_custom_call.1
= control target key start
LH: loop header
LB: loop body
LE: loop exit
PB: predicated region body
PF: predicated region fallthrough
CT: control target
= control target key end

     0   :  { %10 = vsyncpa [#allocation3], 0  ;;  %s4498_s0 = inlined_call_operand.vmem [shape: s32[512,4], index: 0, kind: input, shape index: {}]   ;;  %s4499_s1 = inlined_call_operand.hbm [shape: f32[4,256,128], index: 1, kind: input, shape index: {}]   ;;  %s4500_s2 = inlined_call_operand.vmem [shape: f32[1,128], index: 2, kind: input, shape index: {}]   ;;  %s4501_s3 = inlined_call_operand.vmem [shape: f32[128,256], index: 3, kind: input, shape index: {}]   ;;  %s4502_s4 = inlined_call_operand.vmem [shape: f32[1,256], index: 4, kind: input, shape index: {}]   ;;  %s4503_s5 = inlined_call_operand.hbm [shape: f32[512,256], index: 5, kind: output, shape index: {}]  }
   0x1   :  { %11 = vsyncpa [#allocation4], 0 }
   0x2   :  { %13 = vsyncpa [#allocation4 + $0x1], 0  ;;  %s3352_s18 = smov 0   ;;  %s3354_s19 = smov 0  }
   0x3   :  { %s3356_s20 = smov 0   ;;  %s3358_s21 = smov 0  }
   0x4 LB: > { %s3373_s22 = sadd.s32 4294967295, %s3308_s21   ;;  %s2264_s23 = sadd.s32 4294967294, %s3308_s21   ;;  %s3308_s21 = sphi %s3358_s21, %s4519_s21   ;;  %s3304_s20 = sphi %s3356_s20, %s4518_s20   ;;  %s3300_s19 = sphi %s3354_s19, %s4517_s19   ;;  %s3296_s18 = sphi %s3352_s18, %s4516_s18  }
   0x5   : > { %s3377_s24 = sadd.s32 1, %s3308_s21   ;;  %s136_s25 = sadd.s32 1, %s3304_s20 }
   0x6   : > { %s133_s26 = ssub.s32 %s3308_s21, %s3377_s24  ;;  %p146_p0 = scmp.ne.s32.totalorder %s3304_s20, %s3300_s19 }
   0x7   : > { %p134_p1 = scmp.eq.s32.totalorder %s133_s26, 0  ;;  %p147_p2 = scmp.eq.s32.totalorder %s3373_s22, 3 }
   0x8   : > { %p152_p3 = scmp.ne.s32.totalorder %s3300_s19, %s3296_s18  ;;  %p153_p4 = scmp.eq.s32.totalorder %s2264_s23, 3 }
   0x9   : > { %s3388_s27 = scalar_select %p134_p1, %s3304_s20, %s136_s25  }
   0xa   : > { %p3390_p5 = por %p147_p2, %p146_p0  ;;  %p3394_p6 = por %p153_p4, %p152_p3 }
   0xb   : > { %p2265_p7 = scmp.ge.s32.totalorder %s3308_s21, 1  ;;  %p160_p8 = scmp.lt.s32.totalorder %s3308_s21, 5 }
   0xc   : > { %s4507_s28 = scalar_select %p3390_p5, 1, 0 }
   0xd   : > { %s4508_s29 = scalar_select %p3394_p6, 1, 0 }
   0xe   : > { %p4504_p9 = scmp.eq.s32.totalorder %s3373_s22, 0  ;;  %p3401_p10 = pnand %p2265_p7, %p160_p8 }
   0xf   : > { %s3310_s6 = smov [#allocation2]   ;;  %s3214_s11 = scalar_lea.hbm %s4499_s1, 16384 }
  0x10   : > { %s4509_s30 = scalar_select %p3401_p10, 1, 0 }
  0x11   : > { %s172_s7 = sshll.u32 %s3310_s6, 4  ;;  %p3040_p11 = pneg %p3401_p10  ;;  %s173_s7 = int_to_ptr.vmem [resolvable:$true] %s172_s7 }
  0x12   : > { %p3215_p13 = scmp.ne.s32.totalorder %s4499_s1, %s3214_s11  ;;  %p3221_p3 = scmp.lt.u32.totalorder %s3214_s11, %s4499_s1 }
  0x13   : > { %p3409_p12 = pnand %p4504_p9, %p3040_p11 }
  0x15   : > { %p3216_p0 = pneg %p3409_p12 }
  0x17   : > { %p3217_p1 = pnand %p3216_p0, %p3215_p13 }
  0x19   : > { %p3218_p2 = pneg %p3217_p1 }
  0x1b   : > { %p3223_p4 = pnand %p3221_p3, %p3218_p2 }
  0x1d   : > { %3226 = shalt.err (!%p3223_p4)
}
  0x1e   : > { %s3227_s16 = scalar_lea.vmem %s173_s7, 16384  ;;  %p3235_p9 = scmp.lt.s32.totalorder %s173_s7, %s173_s7 }
  0x1f   : > { %p3228_p7 = scmp.ne.s32.totalorder %s173_s7, %s3227_s16  ;;  %p3236_p6 = scmp.lt.s32.totalorder %s3227_s16, %s3227_s16 }
  0x21   : > { %p3230_p8 = pnand %p3228_p7, %p3216_p0  ;;  %p3237_p5 = por %p3236_p6, %p3235_p9 }
  0x23   : > { %p3231_p11 = pneg %p3230_p8 }
  0x25   : > { %p3238_p10 = pnand %p3237_p5, %p3231_p11 }
  0x27   : > { %3241 = shalt.err (!%p3238_p10)
}
  0x28   : > { %s3311_s17 = smov 128   ;;  %s3312_s23 = smov 8  }
  0x29   : > { %3043 = dma.hbm_to_vmem [thread:$0]  (!%p3409_p12), %s4499_s1, 16384, %s173_s7, [#allocation3], %s3311_s17, %s3311_s17, %s3312_s23  }
  0x2a   : > { %p4511_p13 = scmp.ne.s32.totalorder %s4509_s30, 0 }
  0x2b   : > { %p4512_p1 = scmp.eq.s32.totalorder (!%p4511_p13), %s3373_s22, 0 }
  0x2c   : > { %206 = sbr.rel (%p4511_p13) target bundleno = 1123 (0x463), region = 40 }
  0x33   : > { %3287 = dma.done.wait (%p4512_p1), [#allocation3], 16384   ;;  %p4513_p0 = pmov %p4512_p1 }
  0x34   : > { %s2271_s6 = sshll.u32 %s3373_s22, 4  ;;  %v3313_v0 = vmov 1   ;;  %v661_v29 = vld [vmem:[#allocation2 + $0x180] sm:$0xff]  ;;  %v662_v30 = vld [vmem:[#allocation2 + $0x188] sm:$0xff]  ;;  %v663_v37 = vld [vmem:[#allocation2 + $0x190] sm:$0xff]  ;;  %v3314_v53 = vmov 0  }
  0x35   : > { %3289 = vsyncadd (%p4513_p0), [#allocation3], 4294950912  ;;  %3095 = vset.pattern.permute.xlu1 %v3313_v0  ;;  %3094 = vset.pattern.permute.xlu0 %v3313_v0  ;;  %p235_p5 = scmp.lt.s32.totalorder %s2271_s6, 63  ;;  %v645_v33 = vld [vmem:[#allocation2 + $0x100] sm:$0xff]  ;;  %v646_v34 = vld [vmem:[#allocation2 + $0x108] sm:$0xff]  ;;  %v2858_v41 = vpack.c.bf16 %v662_v30, %v661_v29  ;;  %s231_s14 = sand.u32 1, %s3300_s19  }
  0x36   : > { %v664_v38 = vld [vmem:[#allocation2 + $0x198] sm:$0xff]  ;;  %v2860_v42 = vpack.c.bf16 %v646_v34, %v645_v33  ;;  %v647_v43 = vld [vmem:[#allocation2 + $0x110] sm:$0xff]  ;;  %v665_v45 = vld [vmem:[#allocation2 + $0x1a0] sm:$0xff]  ;;  %s2270_s15 = sshll.u32 %s231_s14, 8  ;;  %s2537_s17 = sshll.u32 %s3373_s22, 12 }
  0x37   : > { %s4521_s6 = smov (!%p235_p5, %s2271_s6), 63  ;;  %v648_v44 = vld [vmem:[#allocation2 + $0x118] sm:$0xff]  ;;  %v666_v46 = vld [vmem:[#allocation2 + $0x1a8] sm:$0xff]  ;;  %3018 = vmatprep.subr.bf16.mxu1 %v2858_v41  ;;  %v2862_v51 = vpack.c.bf16 %v664_v38, %v663_v37  ;;  %2859 = vmatprep.subr.bf16.mxu0 %v2858_v41  ;;  %v649_v57 = vld [vmem:[#allocation2 + $0x120] sm:$0xff]  ;;  %s4382_s16 = scalar_lea.vmem [#allocation5], %s2270_s15 }
  0x38   : > { %s2272_s8 = sshll.u32 %s4521_s6, 3  ;;  %3026 = vmatpush3.bf16.msra.mxu1 %v2860_v42  ;;  %v2864_v52 = vpack.c.bf16 %v648_v44, %v647_v43  ;;  %v2866_v56 = vpack.c.bf16 %v666_v46, %v665_v45  ;;  %v650_v58 = vld [vmem:[#allocation2 + $0x128] sm:$0xff]  ;;  %v667_v59 = vld [vmem:[#allocation2 + $0x1b0] sm:$0xff]  ;;  %v668_v60 = vld [vmem:[#allocation2 + $0x1b8] sm:$0xff]  ;;  %2861 = vmatpush3.bf16.msra.mxu0 %v2860_v42  ;;  %s2190_s23 = sshll.u32 %s4382_s16, 4  ;;  %s4449_s23 = int_to_ptr.vmem [resolvable:$true] %s2190_s23 }
  0x39   : > { %s3441_s30 = scalar_lea.vmem %s4498_s0, %s2272_s8  ;;  %3019 = vmatprep.subr.bf16.mxu1 %v2862_v51  ;;  %v2868_v63 = vpack.c.bf16 %v650_v58, %v649_v57  ;;  %2863 = vmatprep.subr.bf16.mxu0 %v2862_v51  ;;  %v674_v29 = vld [vmem:[#allocation2 + $0x1e8] sm:$0xff]  ;;  %v657_v34 = vld [vmem:[#allocation2 + $0x160] sm:$0xff]  ;;  %v676_v37 = vld [vmem:[#allocation2 + $0x1f8] sm:$0xff]  ;;  %v3316_v51 = vmov 3   ;;  %s4447_s6 = scalar_lea.hbm %s4503_s5, %s2537_s17 }
  0x3a   : > { %v251_v1 = vld [vmem:[%s3441_s30 + $0x50] sm:$0xff]  ;;  %v249_v2 = vld [vmem:[%s3441_s30 + $0x40] sm:$0xff]  ;;  %v252_v3 = vld [vmem:[%s3441_s30 + $0x58] sm:$0xff]  ;;  %s4457_s22 = scalar_lea.sflag [#allocation4], %s231_s14  ;;  %s3242_s8 = scalar_lea.vmem %s4449_s23, 4096 }
  0x3b   : > { %vm277_vm0 = vcmp.gt.s32.totalorder %v251_v1, 0  ;;  %vm273_vm1 = vcmp.gt.s32.totalorder %v249_v2, 0  ;;  %vm279_vm2 = vcmp.gt.s32.totalorder %v252_v3, 0  ;;  %v250_v4 = vld [vmem:[%s3441_s30 + $0x48] sm:$0xff]  ;;  %v253_v9 = vld [vmem:[%s3441_s30 + $0x60] sm:$0xff]  ;;  %v256_v10 = vld [vmem:[%s3441_s30 + $0x78] sm:$0xff]  ;;  %p3243_p6 = scmp.ne.s32.totalorder %s4449_s23, %s3242_s8 }
  0x3c   : > { %v254_v5 = vld [vmem:[%s3441_s30 + $0x68] sm:$0xff]  ;;  %v278_v6 = vsel %vm277_vm0, %v251_v1, 0  ;;  %v274_v7 = vsel %vm273_vm1, %v249_v2, 0  ;;  %v280_v8 = vsel %vm279_vm2, %v252_v3, 0  ;;  %vm275_vm3 = vcmp.gt.s32.totalorder %v250_v4, 0  ;;  %v255_v12 = vld [vmem:[%s3441_s30 + $0x70] sm:$0xff]  ;;  %3027 = vmatpush3.bf16.msra.mxu1 %v2864_v52  ;;  %2865 = vmatpush3.bf16.msra.mxu0 %v2864_v52 }
  0x3d   : > { %vm309_vm4 = vcmp.lt.s32.totalorder %v278_v6, 255  ;;  %vm305_vm5 = vcmp.lt.s32.totalorder %v274_v7, 255  ;;  %vm311_vm6 = vcmp.lt.s32.totalorder %v280_v8, 255  ;;  %v276_v11 = vsel %vm275_vm3, %v250_v4, 0  ;;  %v242_v19 = vld [vmem:[%s3441_s30 + $0x8] sm:$0xff]  ;;  %v241_v20 = vld [vmem:[%s3441_s30] sm:$0xff]  ;;  %3020 = vmatprep.subr.bf16.mxu1 %v2866_v56  ;;  %2867 = vmatprep.subr.bf16.mxu0 %v2866_v56 }
  0x3e   : > { %v3451_v13 = vsel %vm309_vm4, %v278_v6, 255  ;;  %v3453_v14 = vsel %vm305_vm5, %v274_v7, 255  ;;  %vm307_vm7 = vcmp.lt.s32.totalorder %v276_v11, 255  ;;  %v3457_v15 = vsel %vm311_vm6, %v280_v8, 255  ;;  %v243_v25 = vld [vmem:[%s3441_s30 + $0x10] sm:$0xff]  ;;  %v244_v26 = vld [vmem:[%s3441_s30 + $0x18] sm:$0xff] }
  0x3f   : > { %531 = vperm.xlu1 %3095, %v3451_v13   ;;  %525 = vperm.xlu0 %3094, %v3453_v14   ;;  %vm283_vm8 = vcmp.gt.s32.totalorder %v254_v5, 0  ;;  %vm281_vm9 = vcmp.gt.s32.totalorder %v253_v9, 0  ;;  %vm287_vm10 = vcmp.gt.s32.totalorder %v256_v10, 0  ;;  %v3459_v16 = vsel %vm307_vm7, %v276_v11, 255  ;;  %v245_v35 = vld [vmem:[%s3441_s30 + $0x20] sm:$0xff]  ;;  %v246_v36 = vld [vmem:[%s3441_s30 + $0x28] sm:$0xff] }
  0x40   : > { %v284_v17 = vsel %vm283_vm8, %v254_v5, 0  ;;  %v282_v18 = vsel %vm281_vm9, %v253_v9, 0  ;;  %vm285_vm11 = vcmp.gt.s32.totalorder %v255_v12, 0  ;;  %v288_v21 = vsel %vm287_vm10, %v256_v10, 0  ;;  %v247_v49 = vld [vmem:[%s3441_s30 + $0x30] sm:$0xff]  ;;  %v248_v50 = vld [vmem:[%s3441_s30 + $0x38] sm:$0xff]  ;;  %3028 = vmatpush3.bf16.msra.mxu1 %v2868_v63  ;;  %2869 = vmatpush3.bf16.msra.mxu0 %v2868_v63 }
  0x41   : > { %vm315_vm12 = vcmp.lt.s32.totalorder %v284_v17, 255  ;;  %vm313_vm13 = vcmp.lt.s32.totalorder %v282_v18, 255  ;;  %v286_v22 = vsel %vm285_vm11, %v255_v12, 0  ;;  %vm259_vm14 = vcmp.gt.s32.totalorder %v242_v19, 0  ;;  %v651_v4 = vld [vmem:[#allocation2 + $0x130] sm:$0xff]  ;;  %v652_v5 = vld [vmem:[#allocation2 + $0x138] sm:$0xff] }
  0x42   : > { %v3465_v23 = vsel %vm315_vm12, %v284_v17, 255  ;;  %v3467_v24 = vsel %vm313_vm13, %v282_v18, 255  ;;  %vm257_vm15 = vcmp.gt.s32.totalorder %v241_v20, 0  ;;  %vm319_vm0 = vcmp.lt.s32.totalorder %v288_v21, 255  ;;  %v669_v6 = vld [vmem:[#allocation2 + $0x1c0] sm:$0xff]  ;;  %v670_v7 = vld [vmem:[#allocation2 + $0x1c8] sm:$0xff] }
  0x43   : > { %534 = vperm.xlu1 %3095, %v3457_v15   ;;  %528 = vperm.xlu0 %3094, %v3459_v16   ;;  %vm317_vm1 = vcmp.lt.s32.totalorder %v286_v22, 255  ;;  %v260_v27 = vsel %vm259_vm14, %v242_v19, 0  ;;  %v258_v28 = vsel %vm257_vm15, %v241_v20, 0  ;;  %v3473_v31 = vsel %vm319_vm0, %v288_v21, 255  ;;  %v653_v12 = vld [vmem:[#allocation2 + $0x140] sm:$0xff]  ;;  %v654_v17 = vld [vmem:[#allocation2 + $0x148] sm:$0xff] }
  0x44   : > { %v3475_v32 = vsel %vm317_vm1, %v286_v22, 255  ;;  %vm261_vm2 = vcmp.gt.s32.totalorder %v243_v25, 0  ;;  %vm263_vm3 = vcmp.gt.s32.totalorder %v244_v26, 0  ;;  %vm291_vm4 = vcmp.lt.s32.totalorder %v260_v27, 255  ;;  %v671_v18 = vld [vmem:[#allocation2 + $0x1d0] sm:$0xff]  ;;  %v672_v19 = vld [vmem:[#allocation2 + $0x1d8] sm:$0xff] }
  0x45   : > { %vm289_vm5 = vcmp.lt.s32.totalorder %v258_v28, 255  ;;  %v262_v39 = vsel %vm261_vm2, %v243_v25, 0  ;;  %v264_v40 = vsel %vm263_vm3, %v244_v26, 0  ;;  %vm265_vm6 = vcmp.gt.s32.totalorder %v245_v35, 0  ;;  %v655_v26 = vld [vmem:[#allocation2 + $0x150] sm:$0xff]  ;;  %v660_v41 = vld [vmem:[#allocation2 + $0x178] sm:$0xff] }
  0x46   : > { %vm267_vm7 = vcmp.gt.s32.totalorder %v246_v36, 0  ;;  %v3482_v47 = vsel %vm291_vm4, %v260_v27, 255  ;;  %v3485_v48 = vsel %vm289_vm5, %v258_v28, 255  ;;  %vm293_vm8 = vcmp.lt.s32.totalorder %v262_v39, 255  ;;  %v656_v27 = vld [vmem:[#allocation2 + $0x158] sm:$0xff]  ;;  %v673_v28 = vld [vmem:[#allocation2 + $0x1e0] sm:$0xff] }
  0x47   : > { %540 = vperm.xlu1 %3095, %v3465_v23   ;;  %537 = vperm.xlu0 %3094, %v3467_v24   ;;  %vm295_vm9 = vcmp.lt.s32.totalorder %v264_v40, 255  ;;  %v266_v54 = vsel %vm265_vm6, %v245_v35, 0  ;;  %v268_v55 = vsel %vm267_vm7, %v246_v36, 0  ;;  %vm269_vm10 = vcmp.gt.s32.totalorder %v247_v49, 0  ;;  %v658_v35 = vld [vmem:[#allocation2 + $0x168] sm:$0xff]  ;;  %v675_v36 = vld [vmem:[#allocation2 + $0x1f0] sm:$0xff] }
  0x48   : > { %vm271_vm11 = vcmp.gt.s32.totalorder %v248_v50, 0  ;;  %v3494_v61 = vsel %vm293_vm8, %v262_v39, 255  ;;  %v3497_v62 = vsel %vm295_vm9, %v264_v40, 255  ;;  %vm297_vm12 = vcmp.lt.s32.totalorder %v266_v54, 255  ;;  %v659_v40 = vld [vmem:[#allocation2 + $0x170] sm:$0xff]  ;;  %v484_v42 = vld [vmem:[#allocation2 + $0x80] sm:$0xff] }
  0x49   : > { %vm299_vm13 = vcmp.lt.s32.totalorder %v268_v55, 255  ;;  %v270_v1 = vsel %vm269_vm10, %v247_v49, 0  ;;  %v272_v2 = vsel %vm271_vm11, %v248_v50, 0  ;;  %v2870_v3 = vpack.c.bf16 %v668_v60, %v667_v59  ;;  %v485_v43 = vld [vmem:[#allocation2 + $0x88] sm:$0xff]  ;;  %v1128_v45 = vld [vmem:[#allocation2 + $0x280] sm:$0xff]  ;;  %v487_v56 = vld [vmem:[#allocation2 + $0x98] sm:$0xff] }
  0x4a   : > { %v3501_v8 = vsel %vm297_vm12, %v266_v54, 255  ;;  %v3503_v9 = vsel %vm299_vm13, %v268_v55, 255  ;;  %vm301_vm14 = vcmp.lt.s32.totalorder %v270_v1, 255  ;;  %vm303_vm15 = vcmp.lt.s32.totalorder %v272_v2, 255  ;;  %v1129_v46 = vld [vmem:[#allocation2 + $0x288] sm:$0xff]  ;;  %v486_v55 = vld [vmem:[#allocation2 + $0x90] sm:$0xff] }
  0x4b   : > { %546 = vperm.xlu1 %3095, %v3473_v31   ;;  %543 = vperm.xlu0 %3094, %v3475_v32   ;;  %v2872_v10 = vpack.c.bf16 %v652_v5, %v651_v4  ;;  %v2874_v11 = vpack.c.bf16 %v670_v7, %v669_v6  ;;  %v3507_v20 = vsel %vm301_vm14, %v270_v1, 255  ;;  %v3509_v21 = vsel %vm303_vm15, %v272_v2, 255  ;;  %v469_v54 = vld [vmem:[#allocation2 + $0x8] sm:$0xff]  ;;  %v470_v60 = vld [vmem:[#allocation2 + $0x10] sm:$0xff]  ;;  %v472_v5 = vld [vmem:[#allocation2 + $0x20] sm:$0xff]  ;;  %p4514_p9 = scmp.ne.s32.totalorder %s4507_s28, 0 }
  0x4c   : > { %3021 = vmatprep.subr.bf16.mxu1 %v2870_v3  ;;  %v2876_v22 = vpack.c.bf16 %v654_v17, %v653_v12  ;;  %2871 = vmatprep.subr.bf16.mxu0 %v2870_v3  ;;  %v2878_v25 = vpack.c.bf16 %v672_v19, %v671_v18  ;;  %v2880_v30 = vpack.c.bf16 %v656_v27, %v655_v26  ;;  %v3315_v50 = vmov 2   ;;  %v489_v63 = vld [vmem:[#allocation2 + $0xa8] sm:$0xff]  ;;  %v490_v7 = vld [vmem:[#allocation2 + $0xb0] sm:$0xff]  ;;  %v475_v17 = vld [vmem:[#allocation2 + $0x38] sm:$0xff]  ;;  %s3319_s7 = smov [#allocation5]  }
  0x4d   : > { %3029 = vmatpush3.bf16.msra.mxu1 %v2872_v10  ;;  %2873 = vmatpush3.bf16.msra.mxu0 %v2872_v10  ;;  %v2882_v33 = vpack.c.bf16 %v674_v29, %v673_v28  ;;  %v2884_v38 = vpack.c.bf16 %v658_v35, %v657_v34  ;;  %v2886_v39 = vpack.c.bf16 %v676_v37, %v675_v36  ;;  %v473_v6 = vld [vmem:[#allocation2 + $0x28] sm:$0xff]  ;;  %v474_v12 = vld [vmem:[#allocation2 + $0x30] sm:$0xff]  ;;  %v492_v18 = vld [vmem:[#allocation2 + $0xc0] sm:$0xff]  ;;  %p3244_p10 = pnand %p3243_p6, %p4514_p9  ;;  %s3246_s9 = sshll.u32 %s3319_s7, 4  ;;  %s3247_s9 = int_to_ptr.vmem [resolvable:$false] %s3246_s9 }
  0x4e   : > { %3022 = vmatprep.subr.bf16.mxu1 %v2874_v11  ;;  %2875 = vmatprep.subr.bf16.mxu0 %v2874_v11  ;;  %v2890_v44 = vpack.c.bf16 %v485_v43, %v484_v42  ;;  %v2922_v49 = vpack.c.bf16 %v1129_v46, %v1128_v45  ;;  %v2894_v59 = vpack.c.bf16 %v487_v56, %v486_v55  ;;  %v493_v19 = vld [vmem:[#allocation2 + $0xc8] sm:$0xff]  ;;  %v494_v27 = vld [vmem:[#allocation2 + $0xd0] sm:$0xff]  ;;  %v495_v28 = vld [vmem:[#allocation2 + $0xd8] sm:$0xff]  ;;  %s3248_s30 = scalar_lea.vmem %s3247_s9, 8192  ;;  %p3249_p2 = scmp.lt.s32.totalorder %s4449_s23, %s3247_s9 }
  0x4f   : > { %3097 = vset.pattern.permute.xlu1 %v3314_v53  ;;  %3096 = vset.pattern.permute.xlu0 %v3314_v53  ;;  %v468_v53 = vld [vmem:[#allocation2] sm:$0xff]  ;;  %v2900_v10 = vpack.c.bf16 %v473_v6, %v472_v5  ;;  %v477_v26 = vld [vmem:[#allocation2 + $0x48] sm:$0xff]  ;;  %v478_v34 = vld [vmem:[#allocation2 + $0x50] sm:$0xff]  ;;  %p3245_p12 = pneg %p3244_p10  ;;  %p3250_p3 = scmp.lt.s32.totalorder %s3248_s30, %s3242_s8 }
  0x50   : > { %328 = vperm.xlu1 %3097, %v3482_v47   ;;  %325 = vperm.xlu0 %3096, %v3485_v48   ;;  %v479_v35 = vld [vmem:[#allocation2 + $0x58] sm:$0xff]  ;;  %v496_v36 = vld [vmem:[#allocation2 + $0xe0] sm:$0xff]  ;;  %v497_v37 = vld [vmem:[#allocation2 + $0xe8] sm:$0xff] }
  0x51   : > { %3030 = vmatpush3.bf16.msra.mxu1 %v2876_v22  ;;  %2877 = vmatpush3.bf16.msra.mxu0 %v2876_v22  ;;  %v2906_v22 = vpack.c.bf16 %v493_v19, %v492_v18  ;;  %v480_v42 = vld [vmem:[#allocation2 + $0x60] sm:$0xff]  ;;  %v481_v43 = vld [vmem:[#allocation2 + $0x68] sm:$0xff]  ;;  %p3251_p4 = por %p3250_p3, %p3249_p2 }
  0x52   : > { %3023 = vmatprep.subr.bf16.mxu1 %v2878_v25  ;;  %2879 = vmatprep.subr.bf16.mxu0 %v2878_v25  ;;  %v476_v25 = vld [vmem:[#allocation2 + $0x40] sm:$0xff]  ;;  %v2916_v45 = vpack.c.bf16 %v481_v43, %v480_v42  ;;  %v1467_v55 = vld [vmem:[#allocation2 + $0x388] sm:$0xff] }
  0x53   : > { %v2908_v29 = vpack.c.bf16 %v477_v26, %v476_v25  ;;  %v1134_v26 = vld [vmem:[#allocation2 + $0x2b0] sm:$0xff]  ;;  %v1136_v43 = vld [vmem:[#allocation2 + $0x2c0] sm:$0xff]  ;;  %p3252_p7 = pnand %p3251_p4, %p3245_p12 }
  0x54   : > { %331 = vperm.xlu1 %3097, %v3494_v61   ;;  %334 = vperm.xlu0 %3096, %v3497_v62  }
  0x55   : > { %3031 = vmatpush3.bf16.msra.mxu1 %v2880_v30  ;;  %2881 = vmatpush3.bf16.msra.mxu0 %v2880_v30 }
  0x56   : > { %3024 = vmatprep.subr.bf16.mxu1 %v2882_v33  ;;  %2883 = vmatprep.subr.bf16.mxu0 %v2882_v33  ;;  %v2910_v33 = vpack.c.bf16 %v495_v28, %v494_v27  ;;  %v1454_v28 = vld [vmem:[#allocation2 + $0x320] sm:$0xff] }
  0x58   : > { %337 = vperm.xlu1 %3097, %v3501_v8   ;;  %340 = vperm.xlu0 %3096, %v3503_v9  }
  0x59   : > { %3032 = vmatpush3.bf16.msra.mxu1 %v2884_v38  ;;  %2885 = vmatpush3.bf16.msra.mxu0 %v2884_v38  ;;  %v2912_v38 = vpack.c.bf16 %v479_v35, %v478_v34 }
  0x5a   : > { %3025 = vmatprep.subr.bf16.mxu1 %v2886_v39  ;;  %2887 = vmatprep.subr.bf16.mxu0 %v2886_v39 }
  0x5c   : > { %343 = vperm.xlu1 %3097, %v3507_v20   ;;  %346 = vperm.xlu0 %3096, %v3509_v21  }
  0x60   : > { %3098 = vset.pattern.permute.xlu1 %v3313_v0  ;;  %349 = vperm.xlu0 %3096, %v3453_v14   ;;  %v2888_v0 = vpack.c.bf16 %v660_v41, %v659_v40  ;;  %v2914_v41 = vpack.c.bf16 %v497_v37, %v496_v36  ;;  %v1118_v36 = vld [vmem:[#allocation2 + $0x230] sm:$0xff]  ;;  %v1119_v37 = vld [vmem:[#allocation2 + $0x238] sm:$0xff] }
  0x61   : > { %501 = vperm.xlu1 %3098, %v3485_v48  }
  0x62   : > { %3033 = vmatpush3.bf16.msra.mxu1 %v2888_v0  ;;  %2889 = vmatpush3.bf16.msra.mxu0 %v2888_v0  ;;  %v498_v0 = vld [vmem:[#allocation2 + $0xf0] sm:$0xff] }
  0x63   : > { %2891 = vmatprep.subr.bf16.mxu1 %v2890_v44  ;;  %2923 = vmatprep.subr.bf16.mxu0 %v2922_v49  ;;  %v499_v44 = vld [vmem:[#allocation2 + $0xf8] sm:$0xff] }
  0x64   : > { %352 = vperm.xlu0 %3096, %v3459_v16  }
  0x65   : > { %504 = vperm.xlu1 %3098, %v3482_v47  }
  0x68   : > { %355 = vperm.xlu0 %3096, %v3451_v13  }
  0x69   : > { %507 = vperm.xlu1 %3098, %v3494_v61  }
  0x6c   : > { %358 = vperm.xlu0 %3096, %v3457_v15  }
  0x6d   : > { %510 = vperm.xlu1 %3098, %v3497_v62  }
  0x70   : > { %361 = vperm.xlu0 %3096, %v3467_v24  }
  0x71   : > { %513 = vperm.xlu1 %3098, %v3501_v8  }
  0x74   : > { %364 = vperm.xlu0 %3096, %v3465_v23  }
  0x75   : > { %516 = vperm.xlu1 %3098, %v3503_v9  }
  0x78   : > { %367 = vperm.xlu0 %3096, %v3475_v32  }
  0x79   : > { %519 = vperm.xlu1 %3098, %v3507_v20  }
  0x7c   : > { %370 = vperm.xlu0 %3096, %v3473_v31  }
  0x7d   : > { %522 = vperm.xlu1 %3098, %v3509_v21  }
  0x80   : > { %3101 = vset.pattern.permute.xlu0 %v3315_v50 }
  0x81   : > { %3099 = vset.pattern.permute.xlu1 %v3315_v50  ;;  %974 = vperm.xlu0 %3101, %v3494_v61  }
  0x82   : > { %968 = vperm.xlu1 %3099, %v3485_v48  }
  0x85   : > { %3102 = vset.pattern.permute.xlu0 %v3316_v51 }
  0x86   : > { %971 = vperm.xlu1 %3099, %v3482_v47   ;;  %1306 = vperm.xlu0 %3102, %v3485_v48  }
  0x8a   : > { %3100 = vset.pattern.permute.xlu1 %v3316_v51  ;;  %1315 = vperm.xlu0 %3102, %v3497_v62  }
  0x8b   : > { %1309 = vperm.xlu1 %3100, %v3482_v47   ;;  %v321_v47 = vlaneseq }
  0x8d   : > { %v3569_v48 = vand.u32 127, %v321_v47 }
  0x8e   : > { %3105 = vset.pattern.permute.xlu0 %v3315_v50 }
  0x8f   : > { %1312 = vperm.xlu1 %3100, %v3494_v61   ;;  %983 = vperm.xlu0 %3105, %v3503_v9   ;;  %v3573_v52 = vadd.s32 128, %v3569_v48  ;;  %v471_v61 = vld [vmem:[#allocation2 + $0x18] sm:$0xff] }
  0x90   : > { %v2896_v3 = vpack.c.bf16 %v471_v61, %v470_v60  ;;  %v1112_v60 = vld [vmem:[#allocation2 + $0x200] sm:$0xff]  ;;  %v1113_v61 = vld [vmem:[#allocation2 + $0x208] sm:$0xff] }
  0x91   : > { %v2924_v6 = vpack.c.bf16 %v1113_v61, %v1112_v60  ;;  %v1138_v60 = vld [vmem:[#allocation2 + $0x2d0] sm:$0xff] }
  0x93   : > { %3103 = vset.pattern.permute.xlu1 %v3315_v50  ;;  %992 = vperm.xlu0 %3105, %v3453_v14  }
  0x94   : > { %977 = vperm.xlu1 %3103, %v3497_v62   ;;  %v488_v62 = vld [vmem:[#allocation2 + $0xa0] sm:$0xff] }
  0x95   : > { %v2898_v4 = vpack.c.bf16 %v489_v63, %v488_v62  ;;  %v1468_v62 = vld [vmem:[#allocation2 + $0x390] sm:$0xff]  ;;  %v1469_v63 = vld [vmem:[#allocation2 + $0x398] sm:$0xff] }
  0x97   : > { %3108 = vset.pattern.permute.xlu0 %v3316_v51 }
  0x98   : > { %980 = vperm.xlu1 %3103, %v3501_v8   ;;  %1324 = vperm.xlu0 %3108, %v3507_v20  }
  0x9c   : > { %3104 = vset.pattern.permute.xlu1 %v3316_v51  ;;  %1333 = vperm.xlu0 %3108, %v3459_v16  }
  0x9d   : > { %1318 = vperm.xlu1 %3104, %v3501_v8   ;;  %v491_v8 = vld [vmem:[#allocation2 + $0xb8] sm:$0xff] }
  0x9e   : > { %v2902_v11 = vpack.c.bf16 %v491_v8, %v490_v7  ;;  %v2958_v7 = vpack.c.bf16 %v1469_v63, %v1468_v62  ;;  %v1132_v8 = vld [vmem:[#allocation2 + $0x2a0] sm:$0xff]  ;;  %v1459_v63 = vld [vmem:[#allocation2 + $0x348] sm:$0xff] }
  0x9f   : > { %v1458_v62 = vld [vmem:[#allocation2 + $0x340] sm:$0xff] }
  0xa0   : > { %3111 = vset.pattern.permute.xlu0 %v3315_v50 }
  0xa1   : > { %1321 = vperm.xlu1 %3104, %v3503_v9   ;;  %1001 = vperm.xlu0 %3111, %v3457_v15  }
  0xa5   : > { %3106 = vset.pattern.permute.xlu1 %v3315_v50  ;;  %3113 = vset.pattern.permute.xlu0 %v3316_v51 }
  0xa6   : > { %986 = vperm.xlu1 %3106, %v3507_v20   ;;  %1342 = vperm.xlu0 %3113, %v3467_v24  }
  0xaa   : > { %989 = vperm.xlu1 %3106, %v3509_v21   ;;  %3115 = vset.pattern.permute.xlu0 %v3315_v50 }
  0xab   : > { %1010 = vperm.xlu0 %3115, %v3475_v32  }
  0xae   : > { %3107 = vset.pattern.permute.xlu1 %v3316_v51 }
  0xaf   : > { %1327 = vperm.xlu1 %3107, %v3509_v21   ;;  %3117 = vset.pattern.permute.xlu0 %v3316_v51  ;;  %v2904_v21 = vpack.c.bf16 %v475_v17, %v474_v12  ;;  %v1470_v12 = vld [vmem:[#allocation2 + $0x3a0] sm:$0xff]  ;;  %v1471_v17 = vld [vmem:[#allocation2 + $0x3a8] sm:$0xff] }
  0xb0   : > { %1351 = vperm.xlu0 %3117, %v3473_v31   ;;  %v2962_v27 = vpack.c.bf16 %v1471_v17, %v1470_v12  ;;  %v1141_v12 = vld [vmem:[#allocation2 + $0x2e8] sm:$0xff] }
  0xb1   : > { %v1479_v17 = vld [vmem:[#allocation2 + $0x3e8] sm:$0xff] }
  0xb3   : > { %1330 = vperm.xlu1 %3107, %v3453_v14   ;;  %v2892_v14 = vpack.c.bf16 %v469_v54, %v468_v53  ;;  %v482_v53 = vld [vmem:[#allocation2 + $0x70] sm:$0xff]  ;;  %v1466_v54 = vld [vmem:[#allocation2 + $0x380] sm:$0xff] }
  0xb7   : > { %3109 = vset.pattern.permute.xlu1 %v3315_v50 }
  0xb8   : > { %995 = vperm.xlu1 %3109, %v3459_v16   ;;  %v3317_v16 = vmov 1.0  }
  0xbc   : > { %998 = vperm.xlu1 %3109, %v3451_v13  }
  0xbe   : > { %v532_v57 = vpop.permute.xlu1 %531  ;;  %v526_v58 = vpop.permute.xlu0 %525 }
  0xbf   : > { %vm564_vm0 = vcmp.eq.s32.totalorder %v526_v58, %v3569_v48  ;;  %vm565_vm1 = vcmp.eq.s32.totalorder %v526_v58, %v3573_v52  ;;  %vm569_vm4 = vcmp.eq.s32.totalorder %v532_v57, %v3573_v52  ;;  %vm568_vm5 = vcmp.eq.s32.totalorder %v532_v57, %v3569_v48 }
  0xc0   : > { %2353 = vmatprep.mubr.msk.f32.mxu1 %vm565_vm1, %v3317_v16  ;;  %3110 = vset.pattern.permute.xlu1 %v3316_v51 }
  0xc1   : > { %2354 = vmatmul.mubr.msk.f32.vlgmr.msra.gmra.mrb[0].mxu1 %vm564_vm0, %v3317_v16  ;;  %1336 = vperm.xlu1 %3110, %v3451_v13  }
  0xc2   : > { %v535_v1 = vpop.permute.xlu1 %534  ;;  %2893 = vmatpush3.bf16.msra.mxu1 %v2892_v14  ;;  %v529_v2 = vpop.permute.xlu0 %528  ;;  %v1450_v14 = vld [vmem:[#allocation2 + $0x300] sm:$0xff] }
  0xc3   : > { %vm566_vm2 = vcmp.eq.s32.totalorder %v529_v2, %v3569_v48  ;;  %vm567_vm3 = vcmp.eq.s32.totalorder %v529_v2, %v3573_v52  ;;  %2895 = vmatprep.subr.bf16.mxu1 %v2894_v59  ;;  %vm571_vm6 = vcmp.eq.s32.totalorder %v535_v1, %v3573_v52  ;;  %vm570_vm7 = vcmp.eq.s32.totalorder %v535_v1, %v3569_v48  ;;  %v1451_v59 = vld [vmem:[#allocation2 + $0x308] sm:$0xff]  ;;  %v1131_v1 = vld [vmem:[#allocation2 + $0x298] sm:$0xff] }
  0xc4   : > { %2355 = vmatprep.mubr.msk.f32.mxu1 %vm567_vm3, %v3317_v16 }
  0xc5   : > { %2356 = vmatmul.mubr.msk.f32.gmra.mrb[2].mxu1 %vm566_vm2, %v3317_v16  ;;  %1339 = vperm.xlu1 %3110, %v3457_v15  }
  0xc6   : > { %v541_v13 = vpop.permute.xlu1 %540  ;;  %2357 = vmatprep.mubr.msk.f32.mxu1 %vm569_vm4, %v3317_v16  ;;  %2897 = vmatpush3.bf16.msra.mxu1 %v2896_v3  ;;  %v538_v9 = vpop.permute.xlu0 %537  ;;  %v1114_v3 = vld [vmem:[#allocation2 + $0x210] sm:$0xff] }
  0xc7   : > { %2899 = vmatprep.subr.bf16.mxu1 %v2898_v4  ;;  %vm573_vm8 = vcmp.eq.s32.totalorder %v538_v9, %v3573_v52  ;;  %vm572_vm9 = vcmp.eq.s32.totalorder %v538_v9, %v3569_v48  ;;  %vm575_vm10 = vcmp.eq.s32.totalorder %v541_v13, %v3573_v52  ;;  %vm574_vm11 = vcmp.eq.s32.totalorder %v541_v13, %v3569_v48  ;;  %v1115_v4 = vld [vmem:[#allocation2 + $0x218] sm:$0xff]  ;;  %v1452_v13 = vld [vmem:[#allocation2 + $0x310] sm:$0xff] }
  0xc8   : > { %v1453_v9 = vld [vmem:[#allocation2 + $0x318] sm:$0xff]  ;;  %v2928_v19 = vpack.c.bf16 %v1115_v4, %v1114_v3  ;;  %v1122_v4 = vld [vmem:[#allocation2 + $0x250] sm:$0xff] }
  0xc9   : > { %2358 = vmatmul.mubr.msk.f32.gmra.mrb[4].mxu1 %vm568_vm5, %v3317_v16  ;;  %3112 = vset.pattern.permute.xlu1 %v3315_v50 }
  0xca   : > { %v3593_v15 = vpop.permute.xlu1 %546  ;;  %2359 = vmatprep.mubr.msk.f32.mxu1 %vm571_vm6, %v3317_v16  ;;  %2901 = vmatpush3.bf16.msra.mxu1 %v2900_v10  ;;  %v544_v20 = vpop.permute.xlu0 %543 }
  0xcb   : > { %1004 = vperm.xlu1 %3112, %v3467_v24   ;;  %2903 = vmatprep.subr.bf16.mxu1 %v2902_v11  ;;  %vm577_vm12 = vcmp.eq.s32.totalorder %v544_v20, %v3573_v52  ;;  %vm576_vm13 = vcmp.eq.s32.totalorder %v544_v20, %v3569_v48  ;;  %vm579_vm14 = vcmp.eq.s32.totalorder %v3593_v15, %v3573_v52  ;;  %v1133_v11 = vld [vmem:[#allocation2 + $0x2a8] sm:$0xff]  ;;  %v1116_v20 = vld [vmem:[#allocation2 + $0x220] sm:$0xff] }
  0xcc   : > { %vm578_vm0 = vcmp.eq.s32.totalorder %v3593_v15, %v3569_v48  ;;  %v2960_v15 = vpack.c.bf16 %v1453_v9, %v1452_v13  ;;  %v2930_v25 = vpack.c.bf16 %v1133_v11, %v1132_v8  ;;  %v1140_v13 = vld [vmem:[#allocation2 + $0x2e0] sm:$0xff]  ;;  %v1461_v11 = vld [vmem:[#allocation2 + $0x358] sm:$0xff] }
  0xcd   : > { %2360 = vmatmul.mubr.msk.f32.gmra.mrb[6].mxu1 %vm570_vm7, %v3317_v16 }
  0xce   : > { %2361 = vmatprep.mubr.msk.f32.mxu1 %vm573_vm8, %v3317_v16  ;;  %2905 = vmatpush3.bf16.msra.mxu1 %v2904_v21  ;;  %v1117_v21 = vld [vmem:[#allocation2 + $0x228] sm:$0xff] }
  0xcf   : > { %1007 = vperm.xlu1 %3112, %v3465_v23   ;;  %v3602_v30 = vpop.permute.xlu1 %328  ;;  %v3604_v24 = vpop.permute.xlu0 %325  ;;  %2907 = vmatprep.subr.bf16.mxu1 %v2906_v22  ;;  %v2932_v35 = vpack.c.bf16 %v1117_v21, %v1116_v20  ;;  %v1124_v20 = vld [vmem:[#allocation2 + $0x260] sm:$0xff]  ;;  %v1125_v21 = vld [vmem:[#allocation2 + $0x268] sm:$0xff] }
  0xd0   : > { %vm373_vm15 = vcmp.eq.s32.totalorder %v3604_v24, %v3573_v52  ;;  %vm372_vm1 = vcmp.eq.s32.totalorder %v3604_v24, %v3569_v48  ;;  %vm375_vm2 = vcmp.eq.s32.totalorder %v3602_v30, %v3573_v52  ;;  %vm374_vm5 = vcmp.eq.s32.totalorder %v3602_v30, %v3569_v48  ;;  %v1135_v24 = vld [vmem:[#allocation2 + $0x2b8] sm:$0xff]  ;;  %v1472_v30 = vld [vmem:[#allocation2 + $0x3b0] sm:$0xff] }
  0xd1   : > { %2362 = vmatmul.mubr.msk.f32.gmra.mrb[8].mxu1 %vm572_vm9, %v3317_v16  ;;  %v2934_v42 = vpack.c.bf16 %v1135_v24, %v1134_v26  ;;  %v2946_v26 = vpack.c.bf16 %v1141_v12, %v1140_v13  ;;  %v1463_v24 = vld [vmem:[#allocation2 + $0x368] sm:$0xff]  ;;  %v1682_v13 = vld [vmem:[%s4501_s3] sm:$0xff] }
  0xd2   : > { %2363 = vmatprep.mubr.msk.f32.mxu1 %vm575_vm10, %v3317_v16  ;;  %2909 = vmatpush3.bf16.msra.mxu1 %v2908_v29  ;;  %v1455_v29 = vld [vmem:[#allocation2 + $0x328] sm:$0xff] }
  0xd3   : > { %3114 = vset.pattern.permute.xlu1 %v3316_v51  ;;  %v3611_v39 = vpop.permute.xlu1 %331  ;;  %v3613_v40 = vpop.permute.xlu0 %334  ;;  %2911 = vmatprep.subr.bf16.mxu1 %v2910_v33  ;;  %v2918_v51 = vpack.c.bf16 %v499_v44, %v498_v0  ;;  %v1473_v33 = vld [vmem:[#allocation2 + $0x3b8] sm:$0xff]  ;;  %v1456_v44 = vld [vmem:[#allocation2 + $0x330] sm:$0xff] }
  0xd4   : > { %1345 = vperm.xlu1 %3114, %v3465_v23   ;;  %v483_v23 = vld [vmem:[#allocation2 + $0x78] sm:$0xff]  ;;  %vm377_vm6 = vcmp.eq.s32.totalorder %v3611_v39, %v3573_v52  ;;  %vm376_vm9 = vcmp.eq.s32.totalorder %v3611_v39, %v3569_v48  ;;  %v2966_v0 = vpack.c.bf16 %v1473_v33, %v1472_v30  ;;  %vm379_vm10 = vcmp.eq.s32.totalorder %v3613_v40, %v3573_v52  ;;  %v1474_v39 = vld [vmem:[#allocation2 + $0x3c0] sm:$0xff] }
  0xd5   : > { %2364 = vmatmul.mubr.msk.f32.gmra.mrb[10].mxu1 %vm574_vm11, %v3317_v16  ;;  %v2920_v56 = vpack.c.bf16 %v483_v23, %v482_v53  ;;  %v1475_v53 = vld [vmem:[#allocation2 + $0x3c8] sm:$0xff]  ;;  %v1143_v30 = vld [vmem:[#allocation2 + $0x2f8] sm:$0xff] }
  0xd6   : > { %2365 = vmatprep.mubr.msk.f32.mxu1 %vm577_vm12, %v3317_v16  ;;  %2913 = vmatpush3.bf16.msra.mxu1 %v2912_v38  ;;  %v2964_v38 = vpack.c.bf16 %v1455_v29, %v1454_v28  ;;  %v2970_v61 = vpack.c.bf16 %v1475_v53, %v1474_v39  ;;  %v1462_v29 = vld [vmem:[#allocation2 + $0x360] sm:$0xff]  ;;  %v1481_v33 = vld [vmem:[#allocation2 + $0x3f8] sm:$0xff] }
  0xd7   : > { %v3620_v46 = vpop.permute.xlu1 %337  ;;  %v3622_v49 = vpop.permute.xlu0 %340  ;;  %2915 = vmatprep.subr.bf16.mxu1 %v2914_v41 }
  0xd8   : > { %1348 = vperm.xlu1 %3114, %v3475_v32   ;;  %v2954_v32 = vpack.c.bf16 %v1467_v55, %v1466_v54  ;;  %v2936_v54 = vpack.c.bf16 %v1119_v37, %v1118_v36  ;;  %v1120_v55 = vld [vmem:[#allocation2 + $0x240] sm:$0xff]  ;;  %v2980_v36 = vpack.c.bf16 %v1463_v24, %v1462_v29  ;;  %v1693_v29 = vld [vmem:[%s4501_s3 + $0x58] sm:$0xff] }
  0xd9   : > { %2366 = vmatmul.mubr.msk.f32.gmra.mrb[12].mxu1 %vm576_vm13, %v3317_v16  ;;  %vm378_vm13 = vcmp.eq.s32.totalorder %v3613_v40, %v3569_v48  ;;  %v1476_v40 = vld [vmem:[#allocation2 + $0x3d0] sm:$0xff]  ;;  %v1690_v24 = vld [vmem:[%s4501_s3 + $0x40] sm:$0xff] }
  0xda   : > { %2367 = vmatprep.mubr.msk.f32.mxu1 %vm579_vm14, %v3317_v16  ;;  %2917 = vmatpush3.bf16.msra.mxu1 %v2916_v45  ;;  %v1457_v45 = vld [vmem:[#allocation2 + $0x338] sm:$0xff]  ;;  %vm381_vm14 = vcmp.eq.s32.totalorder %v3620_v46, %v3573_v52 }
  0xdb   : > { %v3632_v57 = vpop.permute.xlu1 %343  ;;  %v3634_v58 = vpop.permute.xlu0 %346  ;;  %2919 = vmatprep.subr.bf16.mxu1 %v2918_v51  ;;  %v1137_v51 = vld [vmem:[#allocation2 + $0x2c8] sm:$0xff] }
  0xdc   : > { %3116 = vset.pattern.permute.xlu1 %v3315_v50  ;;  %v1130_v50 = vld [vmem:[#allocation2 + $0x290] sm:$0xff] }
  0xdd   : > { %1013 = vperm.xlu1 %3116, %v3473_v31   ;;  %2368 = vmatmul.mubr.msk.f32.gmra.mrb[14].mxu1 %vm578_vm0, %v3317_v16  ;;  %v2956_v31 = vpack.c.bf16 %v1451_v59, %v1450_v14  ;;  %v2926_v10 = vpack.c.bf16 %v1131_v1, %v1130_v50  ;;  %v2938_v59 = vpack.c.bf16 %v1137_v51, %v1136_v43  ;;  %v1139_v50 = vld [vmem:[#allocation2 + $0x2d8] sm:$0xff] }
  0xde   : > { %2921 = vmatpush3.bf16.msra.mxu1 %v2920_v56  ;;  %2369 = vmatprep.mubr.msk.f32.mxu1 %vm373_vm15, %v3317_v16  ;;  %v1121_v56 = vld [vmem:[#allocation2 + $0x248] sm:$0xff]  ;;  %v1477_v1 = vld [vmem:[#allocation2 + $0x3d8] sm:$0xff]  ;;  %v2942_v8 = vpack.c.bf16 %v1139_v50, %v1138_v60 }
  0xdf   : > { %v3647_v2 = vpop.permute.xlu0 %349  ;;  %2955 = vmatprep.subr.bf16.mxu1 %v2954_v32  ;;  %v2968_v32 = vpack.c.bf16 %v1457_v45, %v1456_v44  ;;  %v2940_v3 = vpack.c.bf16 %v1121_v56, %v1120_v55  ;;  %v2974_v9 = vpack.c.bf16 %v1477_v1, %v1476_v40  ;;  %v1465_v43 = vld [vmem:[#allocation2 + $0x378] sm:$0xff] }
  0xe0   : > { %v502_v5 = vpop.permute.xlu1 %501  ;;  %v1127_v44 = vld [vmem:[#allocation2 + $0x278] sm:$0xff] }
  0xe1   : > { %vm548_vm3 = vcmp.eq.s32.totalorder %v502_v5, %v3569_v48  ;;  %2370 = vmatmul.mubr.msk.f32.vlgmr.msra.gmra.mrb[16].mxu1 %vm372_vm1, %v3317_v16  ;;  %vm549_vm4 = vcmp.eq.s32.totalorder %v502_v5, %v3573_v52  ;;  %v1123_v5 = vld [vmem:[#allocation2 + $0x258] sm:$0xff]  ;;  %vm380_vm1 = vcmp.eq.s32.totalorder %v3620_v46, %v3569_v48  ;;  %v1478_v46 = vld [vmem:[#allocation2 + $0x3e0] sm:$0xff] }
  0xe2   : > { %2337 = vmatprep.mubr.msk.f32.mxu0 %vm549_vm4, %v3317_v16  ;;  %2371 = vmatprep.mubr.msk.f32.mxu1 %vm375_vm2, %v3317_v16  ;;  %vm383_vm2 = vcmp.eq.s32.totalorder %v3622_v49, %v3573_v52  ;;  %v2978_v28 = vpack.c.bf16 %v1479_v17, %v1478_v46 }
  0xe3   : > { %2338 = vmatmul.mubr.msk.f32.vlgmr.msra.gmra.mrb[0].mxu0 %vm548_vm3, %v3317_v16  ;;  %v3660_v18 = vpop.permute.xlu0 %352  ;;  %2957 = vmatpush3.bf16.msra.mxu1 %v2956_v31 }
  0xe4   : > { %v505_v22 = vpop.permute.xlu1 %504  ;;  %2925 = vmatpush3.bf16.msra.mxu0 %v2924_v6  ;;  %2959 = vmatprep.subr.bf16.mxu1 %v2958_v7  ;;  %v2972_v6 = vpack.c.bf16 %v1459_v63, %v1458_v62 }
  0xe5   : > { %vm550_vm7 = vcmp.eq.s32.totalorder %v505_v22, %v3569_v48  ;;  %vm551_vm8 = vcmp.eq.s32.totalorder %v505_v22, %v3573_v52  ;;  %2372 = vmatmul.mubr.msk.f32.gmra.mrb[18].mxu1 %vm374_vm5, %v3317_v16  ;;  %2927 = vmatprep.subr.bf16.mxu0 %v2926_v10  ;;  %v1460_v10 = vld [vmem:[#allocation2 + $0x350] sm:$0xff]  ;;  %vm382_vm5 = vcmp.eq.s32.totalorder %v3622_v49, %v3569_v48 }
  0xe6   : > { %2339 = vmatprep.mubr.msk.f32.mxu0 %vm551_vm8, %v3317_v16  ;;  %2373 = vmatprep.mubr.msk.f32.mxu1 %vm377_vm6, %v3317_v16  ;;  %v2976_v22 = vpack.c.bf16 %v1461_v11, %v1460_v10  ;;  %vm385_vm6 = vcmp.eq.s32.totalorder %v3632_v57, %v3573_v52  ;;  %v1480_v49 = vld [vmem:[#allocation2 + $0x3f0] sm:$0xff] }
  0xe7   : > { %2340 = vmatmul.mubr.msk.f32.gmra.mrb[2].mxu0 %vm550_vm7, %v3317_v16  ;;  %v3672_v34 = vpop.permute.xlu0 %355  ;;  %2961 = vmatpush3.bf16.msra.mxu1 %v2960_v15  ;;  %v2944_v15 = vpack.c.bf16 %v1123_v5, %v1122_v4  ;;  %v1684_v10 = vld [vmem:[%s4501_s3 + $0x10] sm:$0xff] }
  0xe8   : > { %v508_v41 = vpop.permute.xlu1 %507  ;;  %2929 = vmatpush3.bf16.msra.mxu0 %v2928_v19  ;;  %2963 = vmatprep.subr.bf16.mxu1 %v2962_v27  ;;  %v1142_v27 = vld [vmem:[#allocation2 + $0x2f0] sm:$0xff]  ;;  %v2988_v12 = vpack.c.bf16 %v1684_v10, %v1682_v13 }
  0xe9   : > { %vm552_vm11 = vcmp.eq.s32.totalorder %v508_v41, %v3569_v48  ;;  %vm553_vm12 = vcmp.eq.s32.totalorder %v508_v41, %v3573_v52  ;;  %2374 = vmatmul.mubr.msk.f32.gmra.mrb[20].mxu1 %vm376_vm9, %v3317_v16  ;;  %2931 = vmatprep.subr.bf16.mxu0 %v2930_v25  ;;  %vm384_vm9 = vcmp.eq.s32.totalorder %v3632_v57, %v3569_v48  ;;  %v1126_v57 = vld [vmem:[#allocation2 + $0x270] sm:$0xff] }
  0xea   : > { %2341 = vmatprep.mubr.msk.f32.mxu0 %vm553_vm12, %v3317_v16  ;;  %2375 = vmatprep.mubr.msk.f32.mxu1 %vm379_vm10, %v3317_v16  ;;  %v2982_v41 = vpack.c.bf16 %v1481_v33, %v1480_v49  ;;  %vm387_vm10 = vcmp.eq.s32.totalorder %v3634_v58, %v3573_v52  ;;  %v2952_v39 = vpack.c.bf16 %v1127_v44, %v1126_v57  ;;  %v1692_v33 = vld [vmem:[%s4501_s3 + $0x50] sm:$0xff] }
  0xeb   : > { %2342 = vmatmul.mubr.msk.f32.gmra.mrb[4].mxu0 %vm552_vm11, %v3317_v16  ;;  %v3684_v23 = vpop.permute.xlu0 %358  ;;  %2965 = vmatpush3.bf16.msra.mxu1 %v2964_v38  ;;  %v2950_v38 = vpack.c.bf16 %v1143_v30, %v1142_v27  ;;  %v1696_v57 = vld [vmem:[%s4501_s3 + $0x70] sm:$0xff] }
  0xec   : > { %v511_v14 = vpop.permute.xlu1 %510  ;;  %2933 = vmatpush3.bf16.msra.mxu0 %v2932_v35  ;;  %2967 = vmatprep.subr.bf16.mxu1 %v2966_v0  ;;  %v2948_v35 = vpack.c.bf16 %v1125_v21, %v1124_v20  ;;  %v1686_v20 = vld [vmem:[%s4501_s3 + $0x20] sm:$0xff] }
  0xed   : > { %vm554_vm15 = vcmp.eq.s32.totalorder %v511_v14, %v3569_v48  ;;  %vm555_vm0 = vcmp.eq.s32.totalorder %v511_v14, %v3573_v52  ;;  %2376 = vmatmul.mubr.msk.f32.gmra.mrb[22].mxu1 %vm378_vm13, %v3317_v16  ;;  %2935 = vmatprep.subr.bf16.mxu0 %v2934_v42  ;;  %v1464_v42 = vld [vmem:[#allocation2 + $0x370] sm:$0xff]  ;;  %vm386_vm13 = vcmp.eq.s32.totalorder %v3634_v58, %v3569_v48 }
  0xee   : > { %2343 = vmatprep.mubr.msk.f32.mxu0 %vm555_vm0, %v3317_v16  ;;  %2377 = vmatprep.mubr.msk.f32.mxu1 %vm381_vm14, %v3317_v16  ;;  %v2984_v45 = vpack.c.bf16 %v1465_v43, %v1464_v42  ;;  %vm389_vm14 = vcmp.eq.s32.totalorder %v3647_v2, %v3573_v52 }
  0xef   : > { %2344 = vmatmul.mubr.msk.f32.gmra.mrb[6].mxu0 %vm554_vm15, %v3317_v16  ;;  %v3696_v31 = vpop.permute.xlu0 %361  ;;  %2969 = vmatpush3.bf16.msra.mxu1 %v2968_v32 }
  0xf0   : > { %v514_v7 = vpop.permute.xlu1 %513  ;;  %2937 = vmatpush3.bf16.msra.mxu0 %v2936_v54  ;;  %2971 = vmatprep.subr.bf16.mxu1 %v2970_v61 }
  0xf1   : > { %vm556_vm3 = vcmp.eq.s32.totalorder %v514_v7, %v3569_v48  ;;  %vm557_vm4 = vcmp.eq.s32.totalorder %v514_v7, %v3573_v52  ;;  %2378 = vmatmul.mubr.msk.f32.gmra.mrb[24].mxu1 %vm380_vm1, %v3317_v16  ;;  %2939 = vmatprep.subr.bf16.mxu0 %v2938_v59  ;;  %vm388_vm1 = vcmp.eq.s32.totalorder %v3647_v2, %v3569_v48  ;;  %v1683_v7 = vld [vmem:[%s4501_s3 + $0x8] sm:$0xff] }
  0xf2   : > { %2345 = vmatprep.mubr.msk.f32.mxu0 %vm557_vm4, %v3317_v16  ;;  %2379 = vmatprep.mubr.msk.f32.mxu1 %vm383_vm2, %v3317_v16  ;;  %vm391_vm2 = vcmp.eq.s32.totalorder %v3660_v18, %v3573_v52 }
  0xf3   : > { %2346 = vmatmul.mubr.msk.f32.gmra.mrb[8].mxu0 %vm556_vm3, %v3317_v16  ;;  %v3708_v19 = vpop.permute.xlu0 %364  ;;  %2973 = vmatpush3.bf16.msra.mxu1 %v2972_v6 }
  0xf4   : > { %v517_v25 = vpop.permute.xlu1 %516  ;;  %2941 = vmatpush3.bf16.msra.mxu0 %v2940_v3  ;;  %2975 = vmatprep.subr.bf16.mxu1 %v2974_v9 }
  0xf5   : > { %vm558_vm7 = vcmp.eq.s32.totalorder %v517_v25, %v3569_v48  ;;  %vm559_vm8 = vcmp.eq.s32.totalorder %v517_v25, %v3573_v52  ;;  %2380 = vmatmul.mubr.msk.f32.gmra.mrb[26].mxu1 %vm382_vm5, %v3317_v16  ;;  %2943 = vmatprep.subr.bf16.mxu0 %v2942_v8  ;;  %vm390_vm5 = vcmp.eq.s32.totalorder %v3660_v18, %v3569_v48  ;;  %v1685_v8 = vld [vmem:[%s4501_s3 + $0x18] sm:$0xff] }
  0xf6   : > { %2347 = vmatprep.mubr.msk.f32.mxu0 %vm559_vm8, %v3317_v16  ;;  %2381 = vmatprep.mubr.msk.f32.mxu1 %vm385_vm6, %v3317_v16  ;;  %vm393_vm6 = vcmp.eq.s32.totalorder %v3672_v34, %v3573_v52  ;;  %v2986_v9 = vpack.c.bf16 %v1685_v8, %v1683_v7 }
  0xf7   : > { %2348 = vmatmul.mubr.msk.f32.gmra.mrb[10].mxu0 %vm558_vm7, %v3317_v16  ;;  %2977 = vmatpush3.bf16.msra.mxu1 %v2976_v22  ;;  %v3724_v0 = vpop.permute.xlu0 %367  ;;  %v1688_v22 = vld [vmem:[%s4501_s3 + $0x30] sm:$0xff] }
  0xf8   : > { %v520_v37 = vpop.permute.xlu1 %519  ;;  %2945 = vmatpush3.bf16.msra.mxu0 %v2944_v15  ;;  %2979 = vmatprep.subr.bf16.mxu1 %v2978_v28  ;;  %v1689_v15 = vld [vmem:[%s4501_s3 + $0x38] sm:$0xff]  ;;  %v1691_v28 = vld [vmem:[%s4501_s3 + $0x48] sm:$0xff] }
  0xf9   : > { %vm560_vm11 = vcmp.eq.s32.totalorder %v520_v37, %v3569_v48  ;;  %vm561_vm12 = vcmp.eq.s32.totalorder %v520_v37, %v3573_v52  ;;  %2382 = vmatmul.mubr.msk.f32.gmra.mrb[28].mxu1 %vm384_vm9, %v3317_v16  ;;  %2947 = vmatprep.subr.bf16.mxu0 %v2946_v26  ;;  %v2992_v26 = vpack.c.bf16 %v1688_v22, %v1686_v20 }
  0xfa   : > { %2349 = vmatprep.mubr.msk.f32.mxu0 %vm561_vm12, %v3317_v16  ;;  %2383 = vmatprep.mubr.msk.f32.mxu1 %vm387_vm10, %v3317_v16  ;;  %vm392_vm10 = vcmp.eq.s32.totalorder %v3672_v34, %v3569_v48  ;;  %v2994_v49 = vpack.c.bf16 %v1693_v29, %v1691_v28 }
  0xfb   : > { %2350 = vmatmul.mubr.msk.f32.gmra.mrb[12].mxu0 %vm560_vm11, %v3317_v16  ;;  %2981 = vmatpush3.bf16.msra.mxu1 %v2980_v36  ;;  %v3741_v53 = vpop.permute.xlu0 %370  ;;  %vm395_vm11 = vcmp.eq.s32.totalorder %v3684_v23, %v3573_v52 }
  0xfc   : > { %v523_v51 = vpop.permute.xlu1 %522  ;;  %2949 = vmatpush3.bf16.msra.mxu0 %v2948_v35  ;;  %2983 = vmatprep.subr.bf16.mxu1 %v2982_v41  ;;  %v2996_v35 = vpack.c.bf16 %v1692_v33, %v1690_v24  ;;  %v1697_v41 = vld [vmem:[%s4501_s3 + $0x78] sm:$0xff] }
  0xfd   : > { %vm562_vm15 = vcmp.eq.s32.totalorder %v523_v51, %v3569_v48  ;;  %vm563_vm0 = vcmp.eq.s32.totalorder %v523_v51, %v3573_v52  ;;  %2384 = vmatmul.mubr.msk.f32.gmra.mrb[30].mxu1 %vm386_vm13, %v3317_v16  ;;  %2951 = vmatprep.subr.bf16.mxu0 %v2950_v38  ;;  %vm394_vm13 = vcmp.eq.s32.totalorder %v3684_v23, %v3569_v48  ;;  %v1695_v38 = vld [vmem:[%s4501_s3 + $0x68] sm:$0xff]  ;;  %v1701_v51 = vld [vmem:[%s4501_s3 + $0x98] sm:$0xff] }
  0xfe   : > { %2351 = vmatprep.mubr.msk.f32.mxu0 %vm563_vm0, %v3317_v16  ;;  %2385 = vmatprep.mubr.msk.f32.mxu1 %vm389_vm14, %v3317_v16  ;;  %vm397_vm14 = vcmp.eq.s32.totalorder %v3696_v31, %v3573_v52  ;;  %vm399_vm0 = vcmp.eq.s32.totalorder %v3708_v19, %v3573_v52  ;;  %v2998_v43 = vpack.c.bf16 %v1697_v41, %v1695_v38 }
  0xff   : > { %2352 = vmatmul.mubr.msk.f32.gmra.mrb[14].mxu0 %vm562_vm15, %v3317_v16  ;;  %2985 = vmatpush3.bf16.msra.mxu1 %v2984_v45  ;;  %vm396_vm15 = vcmp.eq.s32.totalorder %v3696_v31, %v3569_v48  ;;  %v1699_v45 = vld [vmem:[%s4501_s3 + $0x88] sm:$0xff] }
 0x100   : > { %2953 = vmatpush3.bf16.msra.mxu0 %v2952_v39  ;;  %v975_v54 = vpop.permute.xlu0 %974  ;;  %v1700_v39 = vld [vmem:[%s4501_s3 + $0x90] sm:$0xff] }
 0x101   : > { %v969_v58 = vpop.permute.xlu1 %968  ;;  %2386 = vmatmul.mubr.msk.f32.gmra.mrb[32].mxu1 %vm388_vm1, %v3317_v16  ;;  %vm1020_vm9 = vcmp.eq.s32.totalorder %v975_v54, %v3573_v52  ;;  %vm1019_vm12 = vcmp.eq.s32.totalorder %v975_v54, %v3569_v48  ;;  %vm398_vm1 = vcmp.eq.s32.totalorder %v3708_v19, %v3569_v48  ;;  %2987 = vmatprep.subr.bf16.mxu0 %v2986_v9  ;;  %v1687_v19 = vld [vmem:[%s4501_s3 + $0x28] sm:$0xff] }
 0x102   : > { %vm1015_vm3 = vcmp.eq.s32.totalorder %v969_v58, %v3569_v48  ;;  %vm1016_vm4 = vcmp.eq.s32.totalorder %v969_v58, %v3573_v52  ;;  %2387 = vmatprep.mubr.msk.f32.mxu1 %vm391_vm2, %v3317_v16  ;;  %v2990_v21 = vpack.c.bf16 %v1689_v15, %v1687_v19  ;;  %v1705_v58 = vld [vmem:[%s4501_s3 + $0xb8] sm:$0xff] }
 0x103   : > { %2433 = vmatprep.mubr.msk.f32.mxu0 %vm1016_vm4, %v3317_v16  ;;  %vm401_vm4 = vcmp.eq.s32.totalorder %v3724_v0, %v3573_v52 }
 0x104   : > { %2434 = vmatmul.mubr.msk.f32.vlgmr.msra.gmra.mrb[16].mxu0 %vm1015_vm3, %v3317_v16 }
 0x105   : > { %v972_v2 = vpop.permute.xlu1 %971  ;;  %2388 = vmatmul.mubr.msk.f32.gmra.mrb[34].mxu1 %vm390_vm5, %v3317_v16  ;;  %v1307_v18 = vpop.permute.xlu0 %1306  ;;  %vm400_vm5 = vcmp.eq.s32.totalorder %v3724_v0, %v3569_v48  ;;  %2989 = vmatpush1.bf16.msra.mxu0 %v2988_v12  ;;  %v1694_v0 = vld [vmem:[%s4501_s3 + $0x60] sm:$0xff] }
 0x106   : > { %vm1017_vm7 = vcmp.eq.s32.totalorder %v972_v2, %v3569_v48  ;;  %vm1018_vm8 = vcmp.eq.s32.totalorder %v972_v2, %v3573_v52  ;;  %2389 = vmatprep.mubr.msk.f32.mxu1 %vm393_vm6, %v3317_v16  ;;  %2991 = vmatprep.subr.bf16.mxu0 %v2990_v21  ;;  %v3000_v44 = vpack.c.bf16 %v1696_v57, %v1694_v0  ;;  %v1702_v2 = vld [vmem:[%s4501_s3 + $0xa0] sm:$0xff] }
 0x107   : > { %2435 = vmatprep.mubr.msk.f32.mxu0 %vm1018_vm8, %v3317_v16 }
 0x108   : > { %2436 = vmatmul.mubr.msk.f32.gmra.mrb[18].mxu0 %vm1017_vm7, %v3317_v16 }
 0x109   : > { %2390 = vmatmul.mubr.msk.f32.gmra.mrb[36].mxu1 %vm392_vm10, %v3317_v16  ;;  %2437 = vmatprep.mubr.msk.f32.mxu0 %vm1020_vm9, %v3317_v16  ;;  %v1316_v56 = vpop.permute.xlu0 %1315  ;;  %vm403_vm9 = vcmp.eq.s32.totalorder %v3741_v53, %v3573_v52  ;;  %vm1354_vm10 = vcmp.eq.s32.totalorder %v1307_v18, %v3573_v52 }
 0x10a   : > { %v1310_v55 = vpop.permute.xlu1 %1309  ;;  %2391 = vmatprep.mubr.msk.f32.mxu1 %vm395_vm11, %v3317_v16  ;;  %2993 = vmatpush1.bf16.msra.mxu0 %v2992_v26 }
 0x10b   : > { %2995 = vmatprep.subr.bf16.mxu0 %v2994_v49 }
 0x10c   : > { %2438 = vmatmul.mubr.msk.f32.gmra.mrb[20].mxu0 %vm1019_vm12, %v3317_v16  ;;  %vm402_vm12 = vcmp.eq.s32.totalorder %v3741_v53, %v3569_v48  ;;  %v1703_v53 = vld [vmem:[%s4501_s3 + $0xa8] sm:$0xff] }
 0x10d   : > { %2392 = vmatmul.mubr.msk.f32.gmra.mrb[38].mxu1 %vm394_vm13, %v3317_v16  ;;  %vm1353_vm13 = vcmp.eq.s32.totalorder %v1307_v18, %v3569_v48  ;;  %v3006_v54 = vpack.c.bf16 %v1705_v58, %v1703_v53  ;;  %v1704_v18 = vld [vmem:[%s4501_s3 + $0xb0] sm:$0xff] }
 0x10e   : > { %v1313_v34 = vpop.permute.xlu1 %1312  ;;  %2393 = vmatprep.mubr.msk.f32.mxu1 %vm397_vm14, %v3317_v16  ;;  %v984_v32 = vpop.permute.xlu0 %983  ;;  %vm1356_vm14 = vcmp.eq.s32.totalorder %v1310_v55, %v3573_v52  ;;  %2997 = vmatpush1.bf16.msra.mxu0 %v2996_v35 }
 0x10f   : > { %vm1026_vm8 = vcmp.eq.s32.totalorder %v984_v32, %v3573_v52  ;;  %vm1025_vm11 = vcmp.eq.s32.totalorder %v984_v32, %v3569_v48  ;;  %2999 = vmatprep.subr.bf16.mxu0 %v2998_v43  ;;  %v1706_v32 = vld [vmem:[%s4501_s3 + $0xc0] sm:$0xff] }
 0x111   : > { %2394 = vmatmul.mubr.msk.f32.gmra.mrb[40].mxu1 %vm396_vm15, %v3317_v16  ;;  %vm1355_vm15 = vcmp.eq.s32.totalorder %v1310_v55, %v3569_v48  ;;  %v3008_v55 = vpack.c.bf16 %v1704_v18, %v1702_v2 }
 0x112   : > { %2395 = vmatprep.mubr.msk.f32.mxu1 %vm399_vm0, %v3317_v16  ;;  %vm1358_vm0 = vcmp.eq.s32.totalorder %v1313_v34, %v3573_v52  ;;  %v993_v62 = vpop.permute.xlu0 %992  ;;  %3001 = vmatpush1.bf16.msra.mxu0 %v3000_v44 }
 0x113   : > { %v978_v23 = vpop.permute.xlu1 %977 }
 0x114   : > { %vm1021_vm2 = vcmp.eq.s32.totalorder %v978_v23, %v3569_v48  ;;  %vm1022_vm3 = vcmp.eq.s32.totalorder %v978_v23, %v3573_v52 }
 0x115   : > { %2396 = vmatmul.mubr.msk.f32.gmra.mrb[42].mxu1 %vm398_vm1, %v3317_v16  ;;  %2439 = vmatprep.mubr.msk.f32.mxu0 %vm1022_vm3, %v3317_v16  ;;  %vm1357_vm3 = vcmp.eq.s32.totalorder %v1313_v34, %v3569_v48  ;;  %v1707_v34 = vld [vmem:[%s4501_s3 + $0xc8] sm:$0xff] }
 0x116   : > { %2397 = vmatprep.mubr.msk.f32.mxu1 %vm401_vm4, %v3317_v16  ;;  %2440 = vmatmul.mubr.msk.f32.gmra.mrb[22].mxu0 %vm1021_vm2, %v3317_v16  ;;  %vm1360_vm4 = vcmp.eq.s32.totalorder %v1316_v56, %v3573_v52 }
 0x117   : > { %v981_v14 = vpop.permute.xlu1 %980  ;;  %v1325_v40 = vpop.permute.xlu0 %1324 }
 0x118   : > { %vm1023_vm6 = vcmp.eq.s32.totalorder %v981_v14, %v3569_v48  ;;  %vm1024_vm7 = vcmp.eq.s32.totalorder %v981_v14, %v3573_v52  ;;  %v1708_v14 = vld [vmem:[%s4501_s3 + $0xd0] sm:$0xff] }
 0x119   : > { %2398 = vmatmul.mubr.msk.f32.gmra.mrb[44].mxu1 %vm400_vm5, %v3317_v16  ;;  %2441 = vmatprep.mubr.msk.f32.mxu0 %vm1024_vm7, %v3317_v16  ;;  %vm1032_vm7 = vcmp.eq.s32.totalorder %v993_v62, %v3573_v52 }
 0x11a   : > { %2399 = vmatprep.mubr.msk.f32.mxu1 %vm403_vm9, %v3317_v16  ;;  %2442 = vmatmul.mubr.msk.f32.gmra.mrb[24].mxu0 %vm1023_vm6, %v3317_v16 }
 0x11b   : > { %2443 = vmatprep.mubr.msk.f32.mxu0 %vm1026_vm8, %v3317_v16  ;;  %vm1359_vm8 = vcmp.eq.s32.totalorder %v1316_v56, %v3569_v48  ;;  %v1334_v31 = vpop.permute.xlu0 %1333  ;;  %v1709_v56 = vld [vmem:[%s4501_s3 + $0xd8] sm:$0xff] }
 0x11c   : > { %v1319_v59 = vpop.permute.xlu1 %1318  ;;  %v3010_v23 = vpack.c.bf16 %v1709_v56, %v1707_v34 }
 0x11d   : > { %2400 = vmatmul.mubr.msk.f32.gmra.mrb[46].mxu1 %vm402_vm12, %v3317_v16  ;;  %vm1362_vm9 = vcmp.eq.s32.totalorder %v1319_v59, %v3573_v52 }
 0x11e   : > { %2444 = vmatmul.mubr.msk.f32.gmra.mrb[26].mxu0 %vm1025_vm11, %v3317_v16  ;;  %2497 = vmatprep.mubr.msk.f32.mxu1 %vm1354_vm10, %v3317_v16  ;;  %vm1031_vm10 = vcmp.eq.s32.totalorder %v993_v62, %v3569_v48  ;;  %vm1361_vm11 = vcmp.eq.s32.totalorder %v1319_v59, %v3569_v48  ;;  %v3012_v59 = vpack.c.bf16 %v1708_v14, %v1706_v32 }
 0x120   : > { %v1322_v60 = vpop.permute.xlu1 %1321  ;;  %v1002_v4 = vpop.permute.xlu0 %1001 }
 0x121   : > { %2498 = vmatmul.mubr.msk.f32.vlgmr.msra.gmra.mrb[48].mxu1 %vm1353_vm13, %v3317_v16  ;;  %vm1364_vm12 = vcmp.eq.s32.totalorder %v1322_v60, %v3573_v52  ;;  %vm1366_vm13 = vcmp.eq.s32.totalorder %v1325_v40, %v3573_v52 }
 0x122   : > { %2499 = vmatprep.mubr.msk.f32.mxu1 %vm1356_vm14, %v3317_v16  ;;  %vm1363_vm14 = vcmp.eq.s32.totalorder %v1322_v60, %v3569_v48  ;;  %v1711_v60 = vld [vmem:[%s4501_s3 + $0xe8] sm:$0xff] }
 0x125   : > { %v987_v61 = vpop.permute.xlu1 %986  ;;  %2500 = vmatmul.mubr.msk.f32.gmra.mrb[50].mxu1 %vm1355_vm15, %v3317_v16  ;;  %vm1365_vm15 = vcmp.eq.s32.totalorder %v1325_v40, %v3569_v48  ;;  %v1343_v46 = vpop.permute.xlu0 %1342 }
 0x126   : > { %vm1027_vm1 = vcmp.eq.s32.totalorder %v987_v61, %v3569_v48  ;;  %vm1028_vm2 = vcmp.eq.s32.totalorder %v987_v61, %v3573_v52  ;;  %2501 = vmatprep.mubr.msk.f32.mxu1 %vm1358_vm0, %v3317_v16  ;;  %v1713_v61 = vld [vmem:[%s4501_s3 + $0xf8] sm:$0xff] }
 0x127   : > { %2445 = vmatprep.mubr.msk.f32.mxu0 %vm1028_vm2, %v3317_v16  ;;  %v3014_v62 = vpack.c.bf16 %v1713_v61, %v1711_v60 }
 0x128   : > { %2446 = vmatmul.mubr.msk.f32.gmra.mrb[28].mxu0 %vm1027_vm1, %v3317_v16 }
 0x129   : > { %v990_v63 = vpop.permute.xlu1 %989  ;;  %2502 = vmatmul.mubr.msk.f32.gmra.mrb[52].mxu1 %vm1357_vm3, %v3317_v16 }
 0x12a   : > { %vm1029_vm5 = vcmp.eq.s32.totalorder %v990_v63, %v3569_v48  ;;  %vm1030_vm6 = vcmp.eq.s32.totalorder %v990_v63, %v3573_v52  ;;  %2503 = vmatprep.mubr.msk.f32.mxu1 %vm1360_vm4, %v3317_v16  ;;  %v1011_v25 = vpop.permute.xlu0 %1010  ;;  %v1710_v63 = vld [vmem:[%s4501_s3 + $0xe0] sm:$0xff] }
 0x12b   : > { %2447 = vmatprep.mubr.msk.f32.mxu0 %vm1030_vm6, %v3317_v16  ;;  %vm1038_vm6 = vcmp.eq.s32.totalorder %v1002_v4, %v3573_v52 }
 0x12c   : > { %2448 = vmatmul.mubr.msk.f32.gmra.mrb[30].mxu0 %vm1029_vm5, %v3317_v16 }
 0x12d   : > { %2504 = vmatmul.mubr.msk.f32.gmra.mrb[54].mxu1 %vm1359_vm8, %v3317_v16  ;;  %2449 = vmatprep.mubr.msk.f32.mxu0 %vm1032_vm7, %v3317_v16  ;;  %vm1037_vm8 = vcmp.eq.s32.totalorder %v1002_v4, %v3569_v48 }
 0x12e   : > { %v1328_v50 = vpop.permute.xlu1 %1327  ;;  %2505 = vmatprep.mubr.msk.f32.mxu1 %vm1362_vm9, %v3317_v16 }
 0x12f   : > { %vm1368_vm2 = vcmp.eq.s32.totalorder %v1328_v50, %v3573_v52  ;;  %vm1367_vm3 = vcmp.eq.s32.totalorder %v1328_v50, %v3569_v48  ;;  %v1352_v36 = vpop.permute.xlu0 %1351  ;;  %v1712_v50 = vld [vmem:[%s4501_s3 + $0xf0] sm:$0xff] }
 0x130   : > { %2450 = vmatmul.mubr.msk.f32.gmra.mrb[32].mxu0 %vm1031_vm10, %v3317_v16  ;;  %vm1372_vm10 = vcmp.eq.s32.totalorder %v1334_v31, %v3573_v52  ;;  %v3016_v40 = vpack.c.bf16 %v1712_v50, %v1710_v63 }
 0x131   : > { %2506 = vmatmul.mubr.msk.f32.gmra.mrb[56].mxu1 %vm1361_vm11, %v3317_v16  ;;  %vm1371_vm11 = vcmp.eq.s32.totalorder %v1334_v31, %v3569_v48 }
 0x132   : > { %v1331_v1 = vpop.permute.xlu1 %1330  ;;  %2507 = vmatprep.mubr.msk.f32.mxu1 %vm1364_vm12, %v3317_v16 }
 0x133   : > { %vm1370_vm7 = vcmp.eq.s32.totalorder %v1331_v1, %v3573_v52  ;;  %vm1369_vm9 = vcmp.eq.s32.totalorder %v1331_v1, %v3569_v48  ;;  %v3318_v1 = vmov 0.0  }
 0x135   : > { %2508 = vmatmul.mubr.msk.f32.gmra.mrb[58].mxu1 %vm1363_vm14, %v3317_v16 }
 0x136   : > { %2509 = vmatprep.mubr.msk.f32.mxu1 %vm1366_vm13, %v3317_v16 }
 0x137   : > { %v996_v3 = vpop.permute.xlu1 %995 }
 0x138   : > { %vm1033_vm0 = vcmp.eq.s32.totalorder %v996_v3, %v3569_v48  ;;  %vm1034_vm1 = vcmp.eq.s32.totalorder %v996_v3, %v3573_v52 }
 0x139   : > { %2451 = vmatprep.mubr.msk.f32.mxu0 %vm1034_vm1, %v3317_v16  ;;  %2510 = vmatmul.mubr.msk.f32.gmra.mrb[60].mxu1 %vm1365_vm15, %v3317_v16  ;;  %vm1378_vm1 = vcmp.eq.s32.totalorder %v1343_v46, %v3573_v52 }
 0x13a   : > { %2452 = vmatmul.mubr.msk.f32.gmra.mrb[34].mxu0 %vm1033_vm0, %v3317_v16  ;;  %2511 = vmatprep.mubr.msk.f32.mxu1 %vm1368_vm2, %v3317_v16 }
 0x13b   : > { %v999_v5 = vpop.permute.xlu1 %998 }
 0x13c   : > { %vm1035_vm4 = vcmp.eq.s32.totalorder %v999_v5, %v3569_v48  ;;  %vm1036_vm5 = vcmp.eq.s32.totalorder %v999_v5, %v3573_v52 }
 0x13d   : > { %2453 = vmatprep.mubr.msk.f32.mxu0 %vm1036_vm5, %v3317_v16  ;;  %2512 = vmatmul.mubr.msk.f32.gmra.mrb[62].mxu1 %vm1367_vm3, %v3317_v16  ;;  %vm1377_vm3 = vcmp.eq.s32.totalorder %v1343_v46, %v3569_v48 }
 0x13e   : > { %2454 = vmatmul.mubr.msk.f32.gmra.mrb[36].mxu0 %vm1035_vm4, %v3317_v16  ;;  %2513 = vmatprep.mubr.msk.f32.mxu1 %vm1370_vm7, %v3317_v16  ;;  %vm1043_vm7 = vcmp.eq.s32.totalorder %v1011_v25, %v3569_v48 }
 0x13f   : > { %2455 = vmatprep.mubr.msk.f32.mxu0 %vm1038_vm6, %v3317_v16  ;;  %vm1044_vm6 = vcmp.eq.s32.totalorder %v1011_v25, %v3573_v52 }
 0x140   : > { %v1337_v6 = vpop.permute.xlu1 %1336 }
 0x141   : > { %2514 = vmatmul.mubr.msk.f32.gmra.mrb[64].mxu1 %vm1369_vm9, %v3317_v16  ;;  %vm1374_vm12 = vcmp.eq.s32.totalorder %v1337_v6, %v3573_v52  ;;  %vm1373_vm13 = vcmp.eq.s32.totalorder %v1337_v6, %v3569_v48 }
 0x142   : > { %2456 = vmatmul.mubr.msk.f32.gmra.mrb[38].mxu0 %vm1037_vm8, %v3317_v16  ;;  %2515 = vmatprep.mubr.msk.f32.mxu1 %vm1372_vm10, %v3317_v16 }
 0x144   : > { %v1340_v11 = vpop.permute.xlu1 %1339 }
 0x145   : > { %2516 = vmatmul.mubr.msk.f32.gmra.mrb[66].mxu1 %vm1371_vm11, %v3317_v16  ;;  %vm1376_vm14 = vcmp.eq.s32.totalorder %v1340_v11, %v3573_v52  ;;  %vm1375_vm2 = vcmp.eq.s32.totalorder %v1340_v11, %v3569_v48 }
 0x146   : > { %2517 = vmatprep.mubr.msk.f32.mxu1 %vm1374_vm12, %v3317_v16  ;;  %vm1384_vm12 = vcmp.eq.s32.totalorder %v1352_v36, %v3573_v52 }
 0x149   : > { %2518 = vmatmul.mubr.msk.f32.gmra.mrb[68].mxu1 %vm1373_vm13, %v3317_v16  ;;  %vm1383_vm13 = vcmp.eq.s32.totalorder %v1352_v36, %v3569_v48 }
 0x14a   : > { %v1005_v17 = vpop.permute.xlu1 %1004  ;;  %2519 = vmatprep.mubr.msk.f32.mxu1 %vm1376_vm14, %v3317_v16 }
 0x14b   : > { %vm1039_vm15 = vcmp.eq.s32.totalorder %v1005_v17, %v3569_v48  ;;  %vm1040_vm0 = vcmp.eq.s32.totalorder %v1005_v17, %v3573_v52 }
 0x14c   : > { %2457 = vmatprep.mubr.msk.f32.mxu0 %vm1040_vm0, %v3317_v16 }
 0x14d   : > { %2458 = vmatmul.mubr.msk.f32.gmra.mrb[40].mxu0 %vm1039_vm15, %v3317_v16  ;;  %2520 = vmatmul.mubr.msk.f32.gmra.mrb[70].mxu1 %vm1375_vm2, %v3317_v16 }
 0x14e   : > { %v1008_v27 = vpop.permute.xlu1 %1007  ;;  %2521 = vmatprep.mubr.msk.f32.mxu1 %vm1378_vm1, %v3317_v16 }
 0x14f   : > { %vm1041_vm4 = vcmp.eq.s32.totalorder %v1008_v27, %v3569_v48  ;;  %vm1042_vm5 = vcmp.eq.s32.totalorder %v1008_v27, %v3573_v52 }
 0x150   : > { %2459 = vmatprep.mubr.msk.f32.mxu0 %vm1042_vm5, %v3317_v16 }
 0x151   : > { %2460 = vmatmul.mubr.msk.f32.gmra.mrb[42].mxu0 %vm1041_vm4, %v3317_v16  ;;  %2522 = vmatmul.mubr.msk.f32.gmra.mrb[72].mxu1 %vm1377_vm3, %v3317_v16 }
 0x152   : > { %2461 = vmatprep.mubr.msk.f32.mxu0 %vm1044_vm6, %v3317_v16 }
 0x153   : > { %v1346_v30 = vpop.permute.xlu1 %1345 }
 0x154   : > { %vm1379_vm8 = vcmp.eq.s32.totalorder %v1346_v30, %v3569_v48  ;;  %vm1380_vm9 = vcmp.eq.s32.totalorder %v1346_v30, %v3573_v52 }
 0x155   : > { %2462 = vmatmul.mubr.msk.f32.gmra.mrb[44].mxu0 %vm1043_vm7, %v3317_v16  ;;  %2523 = vmatprep.mubr.msk.f32.mxu1 %vm1380_vm9, %v3317_v16 }
 0x156   : > { %2524 = vmatmul.mubr.msk.f32.gmra.mrb[74].mxu1 %vm1379_vm8, %v3317_v16 }
 0x157   : > { %v1349_v37 = vpop.permute.xlu1 %1348 }
 0x158   : > { %vm1381_vm10 = vcmp.eq.s32.totalorder %v1349_v37, %v3569_v48  ;;  %vm1382_vm11 = vcmp.eq.s32.totalorder %v1349_v37, %v3573_v52 }
 0x159   : > { %2525 = vmatprep.mubr.msk.f32.mxu1 %vm1382_vm11, %v3317_v16 }
 0x15a   : > { %2526 = vmatmul.mubr.msk.f32.gmra.mrb[76].mxu1 %vm1381_vm10, %v3317_v16 }
 0x15b   : > { %2527 = vmatprep.mubr.msk.f32.mxu1 %vm1384_vm12, %v3317_v16 }
 0x15c   : > { %v1014_v42 = vpop.permute.xlu1 %1013 }
 0x15d   : > { %vm1045_vm14 = vcmp.eq.s32.totalorder %v1014_v42, %v3569_v48  ;;  %vm1046_vm15 = vcmp.eq.s32.totalorder %v1014_v42, %v3573_v52  ;;  %v3002_v48 = vpack.c.bf16 %v1701_v51, %v1699_v45  ;;  %v1698_v52 = vld [vmem:[%s4501_s3 + $0x80] sm:$0xff] }
 0x15e   : > { %2463 = vmatprep.mubr.msk.f32.mxu0 %vm1046_vm15, %v3317_v16  ;;  %2528 = vmatmul.mubr.msk.f32.gmra.mrb[78].mxu1 %vm1383_vm13, %v3317_v16 }
 0x15f   : > { %2464 = vmatmul.mubr.msk.f32.gmra.mrb[46].mxu0 %vm1045_vm14, %v3317_v16  ;;  %v3004_v16 = vpack.c.bf16 %v1700_v39, %v1698_v52  ;;  %3003 = vmatprep.subr.bf16.mxu0 %v3002_v48 }
 0x160   : > { %1790 = vmatprep.mubr.f32.mxu0 %v3318_v1 }
 0x161   : > { %3005 = vmatpush1.bf16.msra.mxu0 %v3004_v16 }
 0x162   : > { %3007 = vmatprep.subr.bf16.mxu0 %v3006_v54 }
 0x165   : > { %3009 = vmatpush1.bf16.msra.mxu0 %v3008_v55 }
 0x166   : > { %3011 = vmatprep.subr.bf16.mxu0 %v3010_v23 }
 0x169   : > { %3013 = vmatpush1.bf16.msra.mxu0 %v3012_v59 }
 0x16a   : > { %3015 = vmatprep.subr.bf16.mxu0 %v3014_v62 }
 0x16d   : > { %3017 = vmatpush1.bf16.msra.mxu0 %v3016_v40 }
 0x194   : > { %v2594_v31 = vpop.f32.mrb[0].mxu1 }
 0x195   : > { %v2595_v3 = vpop.f32.mrb[1].mxu1 }
 0x196   : > { %v4014_v4 = vadd.f32 %v2595_v3, %v2594_v31 }
 0x198   : > { %v2597_v5 = vpop.f32.mrb[2].mxu1 }
 0x199   : > { %v2598_v6 = vpop.f32.mrb[3].mxu1 }
 0x19a   : > { %v4016_v7 = vadd.f32 %v2598_v6, %v2597_v5 }
 0x19c   : > { %v2600_v8 = vpop.f32.mrb[4].mxu1 }
 0x19d   : > { %v2601_v13 = vpop.f32.mrb[5].mxu1 }
 0x19e   : > { %v4018_v9 = vadd.f32 %v2601_v13, %v2600_v8 }
 0x1a0   : > { %v2603_v10 = vpop.f32.mrb[6].mxu1 }
 0x1a1   : > { %v2604_v11 = vpop.f32.mrb[7].mxu1 }
 0x1a2   : > { %v4020_v12 = vadd.f32 %v2604_v11, %v2603_v10 }
 0x1a4   : > { %v2606_v46 = vpop.f32.mrb[8].mxu1 }
 0x1a5   : > { %v2607_v17 = vpop.f32.mrb[9].mxu1 }
 0x1a6   : > { %v4022_v19 = vadd.f32 %v2607_v17, %v2606_v46 }
 0x1a8   : > { %v2609_v15 = vpop.f32.mrb[10].mxu1 }
 0x1a9   : > { %v2610_v20 = vpop.f32.mrb[11].mxu1 }
 0x1aa   : > { %v4024_v21 = vadd.f32 %v2610_v20, %v2609_v15 }
 0x1ac   : > { %v2612_v22 = vpop.f32.mrb[12].mxu1 }
 0x1ad   : > { %v2613_v25 = vpop.f32.mrb[13].mxu1 }
 0x1ae   : > { %v4026_v26 = vadd.f32 %v2613_v25, %v2612_v22 }
 0x1b0   : > { %v2615_v27 = vpop.f32.mrb[14].mxu1 }
 0x1b1   : > { %v2616_v28 = vpop.f32.mrb[15].mxu1 }
 0x1b2   : > { %v4028_v29 = vadd.f32 %v2616_v28, %v2615_v27 }
 0x1b4   : > { %v2650_v24 = vpop.f32.mrb[16].mxu1 }
 0x1b5   : > { %v2651_v30 = vpop.f32.mrb[17].mxu1 }
 0x1b6   : > { %v2570_v49 = vpop.f32.mrb[0].mxu0  ;;  %v2652_v33 = vadd.f32 %v2651_v30, %v2650_v24 }
 0x1b7   : > { %v2571_v35 = vpop.f32.mrb[1].mxu0 }
 0x1b8   : > { %v2572_v36 = vadd.f32 %v2571_v35, %v2570_v49  ;;  %v2653_v37 = vpop.f32.mrb[18].mxu1 }
 0x1b9   : > { %v2654_v38 = vpop.f32.mrb[19].mxu1 }
 0x1ba   : > { %v889_v41 = vadd.f32 %v2652_v33, %v2572_v36  ;;  %v2655_v42 = vadd.f32 %v2654_v38, %v2653_v37  ;;  %v2573_v43 = vpop.f32.mrb[2].mxu0 }
 0x1bb   : > { %v2574_v0 = vpop.f32.mrb[3].mxu0 }
 0x1bc   : > { %v2575_v57 = vadd.f32 %v2574_v0, %v2573_v43  ;;  %v2656_v44 = vpop.f32.mrb[20].mxu1 }
 0x1bd   : > { %v2657_v45 = vpop.f32.mrb[21].mxu1 }
 0x1be   : > { %v894_v51 = vadd.f32 %v2655_v42, %v2575_v57  ;;  %v2658_v48 = vadd.f32 %v2657_v45, %v2656_v44  ;;  %v2576_v52 = vpop.f32.mrb[4].mxu0 }
 0x1bf   : > { %v2577_v39 = vpop.f32.mrb[5].mxu0 }
 0x1c0   : > { %v2578_v16 = vadd.f32 %v2577_v39, %v2576_v52  ;;  %v2659_v53 = vpop.f32.mrb[22].mxu1 }
 0x1c1   : > { %v2660_v58 = vpop.f32.mrb[23].mxu1 }
 0x1c2   : > { %v899_v54 = vadd.f32 %v2658_v48, %v2578_v16  ;;  %v2661_v2 = vadd.f32 %v2660_v58, %v2659_v53  ;;  %v2579_v18 = vpop.f32.mrb[6].mxu0 }
 0x1c3   : > { %v2580_v55 = vpop.f32.mrb[7].mxu0 }
 0x1c4   : > { %v2581_v34 = vadd.f32 %v2580_v55, %v2579_v18  ;;  %v2662_v56 = vpop.f32.mrb[24].mxu1 }
 0x1c5   : > { %v2663_v23 = vpop.f32.mrb[25].mxu1 }
 0x1c6   : > { %v4030_v32 = vadd.f32 %v2661_v2, %v2581_v34  ;;  %v2664_v14 = vadd.f32 %v2663_v23, %v2662_v56  ;;  %v2582_v59 = vpop.f32.mrb[8].mxu0 }
 0x1c7   : > { %v2583_v60 = vpop.f32.mrb[9].mxu0 }
 0x1c8   : > { %v2584_v61 = vadd.f32 %v2583_v60, %v2582_v59  ;;  %v2665_v62 = vpop.f32.mrb[26].mxu1 }
 0x1c9   : > { %v2666_v63 = vpop.f32.mrb[27].mxu1 }
 0x1ca   : > { %v4032_v50 = vadd.f32 %v2664_v14, %v2584_v61  ;;  %v2667_v40 = vadd.f32 %v2666_v63, %v2665_v62  ;;  %v2585_v31 = vpop.f32.mrb[10].mxu0 }
 0x1cb   : > { %v2586_v3 = vpop.f32.mrb[11].mxu0 }
 0x1cc   : > { %v2587_v5 = vadd.f32 %v2586_v3, %v2585_v31  ;;  %v2668_v6 = vpop.f32.mrb[28].mxu1 }
 0x1cd   : > { %v2669_v8 = vpop.f32.mrb[29].mxu1 }
 0x1ce   : > { %v4034_v13 = vadd.f32 %v2667_v40, %v2587_v5  ;;  %v2670_v10 = vadd.f32 %v2669_v8, %v2668_v6  ;;  %v2588_v11 = vpop.f32.mrb[12].mxu0 }
 0x1cf   : > { %v2589_v46 = vpop.f32.mrb[13].mxu0 }
 0x1d0   : > { %v2590_v17 = vadd.f32 %v2589_v46, %v2588_v11  ;;  %v2671_v15 = vpop.f32.mrb[30].mxu1 }
 0x1d1   : > { %v2672_v20 = vpop.f32.mrb[31].mxu1 }
 0x1d2   : > { %v4036_v22 = vadd.f32 %v2670_v10, %v2590_v17  ;;  %v2673_v25 = vadd.f32 %v2672_v20, %v2671_v15  ;;  %v2591_v27 = vpop.f32.mrb[14].mxu0 }
 0x1d3   : > { %v2592_v28 = vpop.f32.mrb[15].mxu0 }
 0x1d4   : > { %v2593_v24 = vadd.f32 %v2592_v28, %v2591_v27  ;;  %v2674_v30 = vpop.f32.mrb[32].mxu1 }
 0x1d5   : > { %v2675_v49 = vpop.f32.mrb[33].mxu1 }
 0x1d6   : > { %v4038_v33 = vadd.f32 %v2673_v25, %v2593_v24  ;;  %v2676_v35 = vadd.f32 %v2675_v49, %v2674_v30 }
 0x1d7   : > { %v2730_v36 = vpop.f32.mrb[16].mxu0 }
 0x1d8   : > { %v4041_v37 = vadd.f32 %v2676_v35, %v4014_v4  ;;  %v2677_v38 = vpop.f32.mrb[34].mxu1  ;;  %v2731_v42 = vpop.f32.mrb[17].mxu0 }
 0x1d9   : > { %v2732_v43 = vadd.f32 %v2731_v42, %v2730_v36  ;;  %v2678_v0 = vpop.f32.mrb[35].mxu1 }
 0x1da   : > { %v2679_v57 = vadd.f32 %v2678_v0, %v2677_v38 }
 0x1db   : > { %v1289_v44 = vadd.f32 %v2732_v43, %v889_v41  ;;  %v2733_v45 = vpop.f32.mrb[18].mxu0 }
 0x1dc   : > { %v4044_v48 = vadd.f32 %v2679_v57, %v4016_v7  ;;  %v2680_v52 = vpop.f32.mrb[36].mxu1  ;;  %v2734_v39 = vpop.f32.mrb[19].mxu0 }
 0x1dd   : > { %v2735_v16 = vadd.f32 %v2734_v39, %v2733_v45  ;;  %v2681_v53 = vpop.f32.mrb[37].mxu1 }
 0x1de   : > { %v2682_v58 = vadd.f32 %v2681_v53, %v2680_v52 }
 0x1df   : > { %v1290_v2 = vadd.f32 %v2735_v16, %v894_v51  ;;  %v2736_v18 = vpop.f32.mrb[20].mxu0 }
 0x1e0   : > { %v4047_v4 = vadd.f32 %v2682_v58, %v4018_v9  ;;  %v2683_v55 = vpop.f32.mrb[38].mxu1  ;;  %v2737_v34 = vpop.f32.mrb[21].mxu0 }
 0x1e1   : > { %v2738_v56 = vadd.f32 %v2737_v34, %v2736_v18  ;;  %v2684_v23 = vpop.f32.mrb[39].mxu1 }
 0x1e2   : > { %v2685_v14 = vadd.f32 %v2684_v23, %v2683_v55 }
 0x1e3   : > { %v1291_v41 = vadd.f32 %v2738_v56, %v899_v54 }
 0x1e4   : > { %v4050_v59 = vadd.f32 %v2685_v14, %v4020_v12  ;;  %v2686_v7 = vpop.f32.mrb[40].mxu1 }
 0x1e5   : > { %v2687_v60 = vpop.f32.mrb[41].mxu1 }
 0x1e6   : > { %v2688_v61 = vadd.f32 %v2687_v60, %v2686_v7 }
 0x1e8   : > { %v4053_v62 = vadd.f32 %v2688_v61, %v4022_v19  ;;  %v2689_v51 = vpop.f32.mrb[42].mxu1 }
 0x1e9   : > { %v2690_v63 = vpop.f32.mrb[43].mxu1  ;;  %v2739_v40 = vpop.f32.mrb[22].mxu0 }
 0x1ea   : > { %v2691_v9 = vadd.f32 %v2690_v63, %v2689_v51  ;;  %v2740_v31 = vpop.f32.mrb[23].mxu0 }
 0x1eb   : > { %v2741_v3 = vadd.f32 %v2740_v31, %v2739_v40 }
 0x1ec   : > { %v4056_v5 = vadd.f32 %v2691_v9, %v4024_v21  ;;  %v2692_v6 = vpop.f32.mrb[44].mxu1 }
 0x1ed   : > { %v1292_v54 = vadd.f32 %v2741_v3, %v4030_v32  ;;  %v2693_v12 = vpop.f32.mrb[45].mxu1  ;;  %v2742_v8 = vpop.f32.mrb[24].mxu0 }
 0x1ee   : > { %v2694_v10 = vadd.f32 %v2693_v12, %v2692_v6  ;;  %v2743_v11 = vpop.f32.mrb[25].mxu0 }
 0x1ef   : > { %v2744_v46 = vadd.f32 %v2743_v11, %v2742_v8 }
 0x1f0   : > { %v4060_v19 = vadd.f32 %v2694_v10, %v4026_v26  ;;  %v2695_v17 = vpop.f32.mrb[46].mxu1  ;;  %v4070_v26 = vld [vmem:[%s4500_s2] ss:$0 sm:$0xff] }
 0x1f1   : > { %v1293_v15 = vadd.f32 %v2744_v46, %v4032_v50  ;;  %v2696_v20 = vpop.f32.mrb[47].mxu1  ;;  %v2745_v25 = vpop.f32.mrb[26].mxu0 }
 0x1f2   : > { %v2697_v27 = vadd.f32 %v2696_v20, %v2695_v17  ;;  %v2746_v28 = vpop.f32.mrb[27].mxu0 }
 0x1f3   : > { %v2747_v21 = vadd.f32 %v2746_v28, %v2745_v25 }
 0x1f4   : > { %v4064_v24 = vadd.f32 %v2697_v27, %v4028_v29  ;;  %v2810_v32 = vpop.f32.mrb[48].mxu1 }
 0x1f5   : > { %v1294_v30 = vadd.f32 %v2747_v21, %v4034_v13  ;;  %v2811_v49 = vpop.f32.mrb[49].mxu1 }
 0x1f6   : > { %v2812_v35 = vadd.f32 %v2811_v49, %v2810_v32 }
 0x1f8   : > { %v1627_v36 = vadd.f32 %v2812_v35, %v1289_v44  ;;  %v2813_v50 = vpop.f32.mrb[50].mxu1 }
 0x1f9   : > { %v2814_v38 = vpop.f32.mrb[51].mxu1 }
 0x1fa   : > { %v1650_v42 = vadd.f32 %v4070_v26, %v1627_v36  ;;  %v2815_v43 = vadd.f32 %v2814_v38, %v2813_v50 }
 0x1fb   : > { %v2748_v0 = vpop.f32.mrb[28].mxu0 }
 0x1fc   : > { %v1666_v57 = vmax.f32 %v1650_v42, 0.0  ;;  %v1628_v29 = vadd.f32 %v2815_v43, %v1290_v2  ;;  %v2749_v45 = vpop.f32.mrb[29].mxu0  ;;  %v2816_v52 = vpop.f32.mrb[52].mxu1 }
 0x1fd   : > { %v2750_v39 = vadd.f32 %v2749_v45, %v2748_v0  ;;  %v2817_v13 = vpop.f32.mrb[53].mxu1 }
 0x1fe   : > { %v2818_v16 = vadd.f32 %v2817_v13, %v2816_v52  ;;  %1791 = vmatmul.mubr.f32.vlgmr.msra.gmra.mrb[48].mxu0 %v1666_v57  ;;  %v1651_v53 = vadd.f32 %v4070_v26, %v1628_v29 }
 0x1ff   : > { %v1295_v58 = vadd.f32 %v2750_v39, %v4036_v22  ;;  %v2751_v18 = vpop.f32.mrb[30].mxu0  ;;  %1796 = vmatprep.mubr.f32.mxu0 %v3318_v1 }
 0x200   : > { %v1629_v44 = vadd.f32 %v2818_v16, %v1291_v41  ;;  %v2752_v55 = vpop.f32.mrb[31].mxu0  ;;  %v2819_v34 = vpop.f32.mrb[54].mxu1  ;;  %v1667_v56 = vmax.f32 %v1651_v53, 0.0 }
 0x201   : > { %v2753_v23 = vadd.f32 %v2752_v55, %v2751_v18  ;;  %v2820_v14 = vpop.f32.mrb[55].mxu1 }
 0x202   : > { %v2821_v2 = vadd.f32 %v2820_v14, %v2819_v34  ;;  %1797 = vmatmul.mubr.f32.gmra.mrb[50].mxu0 %v1667_v56  ;;  %v1652_v7 = vadd.f32 %v4070_v26, %v1629_v44 }
 0x203   : > { %v1296_v60 = vadd.f32 %v2753_v23, %v4038_v33  ;;  %v2754_v61 = vpop.f32.mrb[32].mxu0  ;;  %1802 = vmatprep.mubr.f32.mxu0 %v3318_v1 }
 0x204   : > { %v1630_v51 = vadd.f32 %v2821_v2, %v1292_v54  ;;  %v2755_v22 = vpop.f32.mrb[33].mxu0  ;;  %v2822_v63 = vpop.f32.mrb[56].mxu1  ;;  %v1668_v40 = vmax.f32 %v1652_v7, 0.0 }
 0x205   : > { %v2756_v9 = vadd.f32 %v2755_v22, %v2754_v61  ;;  %v2823_v41 = vpop.f32.mrb[57].mxu1 }
 0x206   : > { %v2824_v31 = vadd.f32 %v2823_v41, %v2822_v63  ;;  %1803 = vmatmul.mubr.f32.gmra.mrb[52].mxu0 %v1668_v40  ;;  %v1653_v3 = vadd.f32 %v4070_v26, %v1630_v51 }
 0x207   : > { %v1297_v6 = vadd.f32 %v2756_v9, %v4041_v37  ;;  %1808 = vmatprep.mubr.f32.mxu0 %v3318_v1 }
 0x208   : > { %v1631_v12 = vadd.f32 %v2824_v31, %v1293_v15  ;;  %v2825_v8 = vpop.f32.mrb[58].mxu1  ;;  %v1669_v33 = vmax.f32 %v1653_v3, 0.0 }
 0x209   : > { %v2826_v10 = vpop.f32.mrb[59].mxu1 }
 0x20a   : > { %v2827_v11 = vadd.f32 %v2826_v10, %v2825_v8  ;;  %1809 = vmatmul.mubr.f32.gmra.mrb[54].mxu0 %v1669_v33  ;;  %v1654_v54 = vadd.f32 %v4070_v26, %v1631_v12 }
 0x20b   : > { %1814 = vmatprep.mubr.f32.mxu0 %v3318_v1 }
 0x20c   : > { %v1632_v46 = vadd.f32 %v2827_v11, %v1294_v30  ;;  %v2828_v17 = vpop.f32.mrb[60].mxu1  ;;  %v1670_v20 = vmax.f32 %v1654_v54, 0.0 }
 0x20d   : > { %v2757_v25 = vpop.f32.mrb[34].mxu0  ;;  %v2829_v27 = vpop.f32.mrb[61].mxu1 }
 0x20e   : > { %v2830_v28 = vadd.f32 %v2829_v27, %v2828_v17  ;;  %v2758_v21 = vpop.f32.mrb[35].mxu0  ;;  %1815 = vmatmul.mubr.f32.gmra.mrb[56].mxu0 %v1670_v20  ;;  %v1655_v37 = vadd.f32 %v4070_v26, %v1632_v46 }
 0x20f   : > { %v2759_v15 = vadd.f32 %v2758_v21, %v2757_v25  ;;  %1820 = vmatprep.mubr.f32.mxu0 %v3318_v1 }
 0x210   : > { %v1633_v32 = vadd.f32 %v2830_v28, %v1295_v58  ;;  %v2831_v49 = vpop.f32.mrb[62].mxu1  ;;  %v1671_v35 = vmax.f32 %v1655_v37, 0.0 }
 0x211   : > { %v1298_v36 = vadd.f32 %v2759_v15, %v4044_v48  ;;  %v2760_v50 = vpop.f32.mrb[36].mxu0  ;;  %v2832_v38 = vpop.f32.mrb[63].mxu1 }
 0x212   : > { %v2833_v30 = vadd.f32 %v2832_v38, %v2831_v49  ;;  %v2761_v42 = vpop.f32.mrb[37].mxu0  ;;  %1821 = vmatmul.mubr.f32.gmra.mrb[58].mxu0 %v1671_v35  ;;  %v1656_v43 = vadd.f32 %v4070_v26, %v1633_v32 }
 0x213   : > { %v2762_v0 = vadd.f32 %v2761_v42, %v2760_v50  ;;  %1826 = vmatprep.mubr.f32.mxu0 %v3318_v1 }
 0x214   : > { %v1634_v57 = vadd.f32 %v2833_v30, %v1296_v60  ;;  %v2834_v29 = vpop.f32.mrb[64].mxu1  ;;  %v1672_v45 = vmax.f32 %v1656_v43, 0.0 }
 0x215   : > { %v1299_v52 = vadd.f32 %v2762_v0, %v4047_v4  ;;  %v2763_v39 = vpop.f32.mrb[38].mxu0  ;;  %v2835_v13 = vpop.f32.mrb[65].mxu1 }
 0x216   : > { %v2836_v16 = vadd.f32 %v2835_v13, %v2834_v29  ;;  %v2764_v53 = vpop.f32.mrb[39].mxu0  ;;  %1827 = vmatmul.mubr.f32.gmra.mrb[60].mxu0 %v1672_v45  ;;  %v1657_v48 = vadd.f32 %v4070_v26, %v1634_v57 }
 0x217   : > { %v2765_v58 = vadd.f32 %v2764_v53, %v2763_v39  ;;  %1832 = vmatprep.mubr.f32.mxu0 %v3318_v1 }
 0x218   : > { %v1635_v18 = vadd.f32 %v2836_v16, %v1297_v6  ;;  %v2837_v44 = vpop.f32.mrb[66].mxu1  ;;  %v1673_v55 = vmax.f32 %v1657_v48, 0.0 }
 0x219   : > { %v1300_v34 = vadd.f32 %v2765_v58, %v4050_v59  ;;  %v2838_v56 = vpop.f32.mrb[67].mxu1 }
 0x21a   : > { %v2839_v23 = vadd.f32 %v2838_v56, %v2837_v44  ;;  %1833 = vmatmul.mubr.f32.gmra.mrb[62].mxu0 %v1673_v55  ;;  %v1658_v4 = vadd.f32 %v4070_v26, %v1635_v18 }
 0x21b   : > { %1838 = vmatprep.mubr.f32.mxu0 %v3318_v1 }
 0x21c   : > { %v1636_v14 = vadd.f32 %v2839_v23, %v1298_v36  ;;  %v2840_v2 = vpop.f32.mrb[68].mxu1  ;;  %v1674_v7 = vmax.f32 %v1658_v4, 0.0  ;;  %v1714_v23 = vld [vmem:[%s4502_s4] sm:$0x3] }
 0x21d   : > { %v2841_v60 = vpop.f32.mrb[69].mxu1 }
 0x21e   : > { %v2842_v61 = vadd.f32 %v2841_v60, %v2840_v2  ;;  %1839 = vmatmul.mubr.f32.gmra.mrb[64].mxu0 %v1674_v7  ;;  %v1659_v51 = vadd.f32 %v4070_v26, %v1636_v14 }
 0x21f   : > { %1844 = vmatprep.mubr.f32.mxu0 %v3318_v1 }
 0x220   : > { %v1637_v22 = vadd.f32 %v2842_v61, %v1299_v52  ;;  %v2766_v63 = vpop.f32.mrb[40].mxu0  ;;  %v2843_v59 = vpop.f32.mrb[70].mxu1  ;;  %v1675_v40 = vmax.f32 %v1659_v51, 0.0 }
 0x221   : > { %v2767_v9 = vpop.f32.mrb[41].mxu0  ;;  %v2844_v41 = vpop.f32.mrb[71].mxu1 }
 0x222   : > { %v2768_v31 = vadd.f32 %v2767_v9, %v2766_v63  ;;  %v2845_v3 = vadd.f32 %v2844_v41, %v2843_v59  ;;  %1845 = vmatmul.mubr.f32.gmra.mrb[66].mxu0 %v1675_v40  ;;  %v1660_v6 = vadd.f32 %v4070_v26, %v1637_v22 }
 0x223   : > { %1850 = vmatprep.mubr.f32.mxu0 %v3318_v1 }
 0x224   : > { %v1301_v12 = vadd.f32 %v2768_v31, %v4053_v62  ;;  %v1638_v8 = vadd.f32 %v2845_v3, %v1300_v34  ;;  %v2769_v33 = vpop.f32.mrb[42].mxu0  ;;  %v2846_v10 = vpop.f32.mrb[72].mxu1  ;;  %v1676_v11 = vmax.f32 %v1660_v6, 0.0  ;;  %v1717_v34 = vshrl.u32 %v321_v47, 7 }
 0x225   : > { %v2770_v54 = vpop.f32.mrb[43].mxu0  ;;  %v2847_v46 = vpop.f32.mrb[73].mxu1 }
 0x226   : > { %v2771_v17 = vadd.f32 %v2770_v54, %v2769_v33  ;;  %v2848_v20 = vadd.f32 %v2847_v46, %v2846_v10  ;;  %1851 = vmatmul.mubr.f32.gmra.mrb[68].mxu0 %v1676_v11  ;;  %v1661_v25 = vadd.f32 %v4070_v26, %v1638_v8  ;;  %v1718_v56 = vsub.s32 0, %v1717_v34 }
 0x227   : > { %1856 = vmatprep.mubr.f32.mxu0 %v3318_v1  ;;  %v1722_v4 = vsub.s32 1, %v1717_v34 }
 0x228   : > { %v1302_v27 = vadd.f32 %v2771_v17, %v4056_v5  ;;  %v1639_v28 = vadd.f32 %v2848_v20, %v1301_v12  ;;  %v2772_v21 = vpop.f32.mrb[44].mxu0  ;;  %v1677_v37 = vmax.f32 %v1661_v25, 0.0  ;;  %v4117_v14 = vrot.slane %v1714_v23, %v1718_v56 }
 0x229   : > { %v2773_v15 = vpop.f32.mrb[45].mxu0  ;;  %v2849_v62 = vpop.f32.mrb[74].mxu1  ;;  %v4119_v2 = vrot.slane %v1714_v23, %v1722_v4 }
 0x22a   : > { %v2774_v32 = vadd.f32 %v2773_v15, %v2772_v21  ;;  %v2850_v49 = vpop.f32.mrb[75].mxu1  ;;  %1857 = vmatmul.mubr.f32.gmra.mrb[70].mxu0 %v1677_v37  ;;  %v1662_v35 = vadd.f32 %v4070_v26, %v1639_v28 }
 0x22b   : > { %v2851_v36 = vadd.f32 %v2850_v49, %v2849_v62  ;;  %1862 = vmatprep.mubr.f32.mxu0 %v3318_v1 }
 0x22c   : > { %v1303_v50 = vadd.f32 %v2774_v32, %v4060_v19  ;;  %v1678_v38 = vmax.f32 %v1662_v35, 0.0 }
 0x22d   : > { %v1640_v30 = vadd.f32 %v2851_v36, %v1302_v27  ;;  %v2852_v42 = vpop.f32.mrb[76].mxu1 }
 0x22e   : > { %v2853_v43 = vpop.f32.mrb[77].mxu1  ;;  %1863 = vmatmul.mubr.f32.gmra.mrb[72].mxu0 %v1678_v38 }
 0x22f   : > { %v2854_v5 = vadd.f32 %v2853_v43, %v2852_v42  ;;  %1868 = vmatprep.mubr.f32.mxu0 %v3318_v1  ;;  %v1663_v0 = vadd.f32 %v4070_v26, %v1640_v30 }
 0x231   : > { %v1641_v57 = vadd.f32 %v2854_v5, %v1303_v50  ;;  %v2855_v29 = vpop.f32.mrb[78].mxu1  ;;  %v1679_v45 = vmax.f32 %v1663_v0, 0.0 }
 0x232   : > { %v2775_v52 = vpop.f32.mrb[46].mxu0  ;;  %v2856_v39 = vpop.f32.mrb[79].mxu1 }
 0x233   : > { %v2776_v13 = vpop.f32.mrb[47].mxu0  ;;  %v2857_v16 = vadd.f32 %v2856_v39, %v2855_v29  ;;  %1869 = vmatmul.mubr.f32.gmra.mrb[74].mxu0 %v1679_v45  ;;  %v1664_v19 = vadd.f32 %v4070_v26, %v1641_v57 }
 0x234   : > { %v2777_v53 = vadd.f32 %v2776_v13, %v2775_v52  ;;  %1874 = vmatprep.mubr.f32.mxu0 %v3318_v1 }
 0x235   : > { %v1680_v48 = vmax.f32 %v1664_v19, 0.0 }
 0x236   : > { %v1304_v58 = vadd.f32 %v2777_v53, %v4064_v24 }
 0x237   : > { %1875 = vmatmul.mubr.f32.gmra.mrb[76].mxu0 %v1680_v48 }
 0x238   : > { %v1642_v18 = vadd.f32 %v2857_v16, %v1304_v58  ;;  %1880 = vmatprep.mubr.f32.mxu0 %v3318_v1 }
 0x23a   : > { %v1665_v44 = vadd.f32 %v4070_v26, %v1642_v18 }
 0x23c   : > { %v1681_v55 = vmax.f32 %v1665_v44, 0.0 }
 0x23e   : > { %1881 = vmatmul.mubr.f32.gmra.mrb[78].mxu0 %v1681_v55 }
 0x2d1   : > { %v1792_v24 = vpop.f32.mrb[48].mxu0 }
 0x2d2   : > { %v4122_v7 = vadd.f32 %v1792_v24, %v4117_v14  ;;  %v1794_v1 = vpop.f32.mrb[49].mxu0 }
 0x2d3   : > { %v4125_v26 = vadd.f32 %v1794_v1, %v4119_v2 }
 0x2d5   : > { %v1798_v60 = vpop.f32.mrb[50].mxu0  ;;  %v1887_v47 = vmax.f32 %v4122_v7, %v4125_v26 }
 0x2d6   : > { %v4130_v61 = vadd.f32 %v1798_v60, %v4117_v14  ;;  %v1800_v51 = vpop.f32.mrb[51].mxu0 }
 0x2d7   : > { %v4133_v22 = vadd.f32 %v1800_v51, %v4119_v2  ;;  %1888 = vmax.xlane.f32.xlu1 %v1887_v47 }
 0x2d9   : > { %v1804_v63 = vpop.f32.mrb[52].mxu0  ;;  %v1890_v59 = vmax.f32 %v4130_v61, %v4133_v22 }
 0x2da   : > { %v4138_v40 = vadd.f32 %v1804_v63, %v4117_v14  ;;  %v1806_v9 = vpop.f32.mrb[53].mxu0 }
 0x2db   : > { %v4141_v41 = vadd.f32 %v1806_v9, %v4119_v2  ;;  %1891 = vmax.xlane.f32.xlu0 %v1890_v59 }
 0x2dd   : > { %v1810_v31 = vpop.f32.mrb[54].mxu0  ;;  %v1893_v3 = vmax.f32 %v4138_v40, %v4141_v41 }
 0x2de   : > { %v4146_v6 = vadd.f32 %v1810_v31, %v4117_v14  ;;  %v1812_v12 = vpop.f32.mrb[55].mxu0 }
 0x2df   : > { %v4149_v8 = vadd.f32 %v1812_v12, %v4119_v2  ;;  %1894 = vmax.xlane.f32.xlu1 %v1893_v3 }
 0x2e1   : > { %v1816_v33 = vpop.f32.mrb[56].mxu0  ;;  %v1896_v10 = vmax.f32 %v4146_v6, %v4149_v8 }
 0x2e2   : > { %v4154_v11 = vadd.f32 %v1816_v33, %v4117_v14  ;;  %v1818_v54 = vpop.f32.mrb[57].mxu0 }
 0x2e3   : > { %v4157_v46 = vadd.f32 %v1818_v54, %v4119_v2  ;;  %1897 = vmax.xlane.f32.xlu0 %v1896_v10 }
 0x2e5   : > { %v1822_v17 = vpop.f32.mrb[58].mxu0  ;;  %v1899_v20 = vmax.f32 %v4154_v11, %v4157_v46 }
 0x2e6   : > { %v4162_v25 = vadd.f32 %v1822_v17, %v4117_v14  ;;  %v1824_v27 = vpop.f32.mrb[59].mxu0 }
 0x2e7   : > { %v4165_v28 = vadd.f32 %v1824_v27, %v4119_v2  ;;  %1900 = vmax.xlane.f32.xlu1 %v1899_v20 }
 0x2e9   : > { %v1828_v21 = vpop.f32.mrb[60].mxu0  ;;  %v1902_v37 = vmax.f32 %v4162_v25, %v4165_v28 }
 0x2ea   : > { %v4170_v15 = vadd.f32 %v1828_v21, %v4117_v14  ;;  %v1830_v62 = vpop.f32.mrb[61].mxu0 }
 0x2eb   : > { %v4173_v32 = vadd.f32 %v1830_v62, %v4119_v2  ;;  %1903 = vmax.xlane.f32.xlu0 %v1902_v37 }
 0x2ed   : > { %v1834_v49 = vpop.f32.mrb[62].mxu0  ;;  %v1905_v35 = vmax.f32 %v4170_v15, %v4173_v32 }
 0x2ee   : > { %v4178_v36 = vadd.f32 %v1834_v49, %v4117_v14  ;;  %v1836_v50 = vpop.f32.mrb[63].mxu0 }
 0x2ef   : > { %v4181_v38 = vadd.f32 %v1836_v50, %v4119_v2  ;;  %1906 = vmax.xlane.f32.xlu1 %v1905_v35 }
 0x2f1   : > { %v1840_v30 = vpop.f32.mrb[64].mxu0  ;;  %v1908_v42 = vmax.f32 %v4178_v36, %v4181_v38 }
 0x2f2   : > { %v4186_v43 = vadd.f32 %v1840_v30, %v4117_v14  ;;  %v1842_v5 = vpop.f32.mrb[65].mxu0 }
 0x2f3   : > { %v4189_v0 = vadd.f32 %v1842_v5, %v4119_v2  ;;  %1909 = vmax.xlane.f32.xlu0 %v1908_v42 }
 0x2f5   : > { %v1846_v57 = vpop.f32.mrb[66].mxu0  ;;  %v1911_v29 = vmax.f32 %v4186_v43, %v4189_v0 }
 0x2f6   : > { %v4194_v45 = vadd.f32 %v1846_v57, %v4117_v14  ;;  %v1848_v52 = vpop.f32.mrb[67].mxu0 }
 0x2f7   : > { %v4197_v39 = vadd.f32 %v1848_v52, %v4119_v2  ;;  %1912 = vmax.xlane.f32.xlu1 %v1911_v29 }
 0x2f9   : > { %v1852_v13 = vpop.f32.mrb[68].mxu0  ;;  %v1914_v16 = vmax.f32 %v4194_v45, %v4197_v39 }
 0x2fa   : > { %v4202_v19 = vadd.f32 %v1852_v13, %v4117_v14  ;;  %v1854_v53 = vpop.f32.mrb[69].mxu0 }
 0x2fb   : > { %v4205_v48 = vadd.f32 %v1854_v53, %v4119_v2  ;;  %1915 = vmax.xlane.f32.xlu0 %v1914_v16 }
 0x2fd   : > { %v1858_v58 = vpop.f32.mrb[70].mxu0  ;;  %v1917_v18 = vmax.f32 %v4202_v19, %v4205_v48 }
 0x2fe   : > { %v4210_v44 = vadd.f32 %v1858_v58, %v4117_v14  ;;  %v1860_v55 = vpop.f32.mrb[71].mxu0 }
 0x2ff   : > { %v4213_v34 = vadd.f32 %v1860_v55, %v4119_v2  ;;  %1918 = vmax.xlane.f32.xlu1 %v1917_v18 }
 0x301   : > { %v1864_v56 = vpop.f32.mrb[72].mxu0  ;;  %v1920_v23 = vmax.f32 %v4210_v44, %v4213_v34 }
 0x302   : > { %v4218_v4 = vadd.f32 %v1864_v56, %v4117_v14  ;;  %v1866_v24 = vpop.f32.mrb[73].mxu0 }
 0x303   : > { %v4221_v1 = vadd.f32 %v1866_v24, %v4119_v2  ;;  %1921 = vmax.xlane.f32.xlu0 %v1920_v23 }
 0x305   : > { %v1923_v60 = vmax.f32 %v4218_v4, %v4221_v1 }
 0x306   : > { %v1870_v47 = vpop.f32.mrb[74].mxu0 }
 0x307   : > { %v4226_v51 = vadd.f32 %v1870_v47, %v4117_v14  ;;  %v1872_v63 = vpop.f32.mrb[75].mxu0  ;;  %1924 = vmax.xlane.f32.xlu1 %v1923_v60 }
 0x308   : > { %v4229_v59 = vadd.f32 %v1872_v63, %v4119_v2 }
 0x30a   : > { %v1876_v9 = vpop.f32.mrb[76].mxu0  ;;  %v1926_v31 = vmax.f32 %v4226_v51, %v4229_v59 }
 0x30b   : > { %v4234_v3 = vadd.f32 %v1876_v9, %v4117_v14  ;;  %v1878_v12 = vpop.f32.mrb[77].mxu0 }
 0x30c   : > { %v4237_v33 = vadd.f32 %v1878_v12, %v4119_v2  ;;  %1927 = vmax.xlane.f32.xlu0 %v1926_v31 }
 0x30e   : > { %v1929_v10 = vmax.f32 %v4234_v3, %v4237_v33 }
 0x310   : > { %1930 = vmax.xlane.f32.xlu1 %v1929_v10 }
 0x311   : > { %v1882_v54 = vpop.f32.mrb[78].mxu0 }
 0x312   : > { %v4242_v17 = vadd.f32 %v1882_v54, %v4117_v14  ;;  %v1884_v20 = vpop.f32.mrb[79].mxu0 }
 0x313   : > { %v4245_v27 = vadd.f32 %v1884_v20, %v4119_v2 }
 0x315   : > { %v1932_v21 = vmax.f32 %v4242_v17, %v4245_v27 }
 0x317   : > { %1933 = vmax.xlane.f32.xlu0 %v1932_v21 }
 0x364   : > { %v1889_v37 = vpop.xlane.xlu1 %1888 }
 0x365   : > { %v4250_v62 = vsub.f32 %v4122_v7, %v1889_v37  ;;  %v4253_v49 = vsub.f32 %v4125_v26, %v1889_v37 }
 0x367   : > { %v1967_v35 = vmul.f32 1.442695, %v4250_v62  ;;  %v1969_v14 = vmul.f32 1.442695, %v4253_v49 }
 0x368   : > { %v1892_v50 = vpop.xlane.xlu0 %1891 }
 0x369   : > { %3118 = vpow2.f32 %v1967_v35  ;;  %v4258_v2 = vsub.f32 %v4130_v61, %v1892_v50  ;;  %v4261_v30 = vsub.f32 %v4133_v22, %v1892_v50 }
 0x36a   : > { %3120 = vpow2.f32 %v1969_v14 }
 0x36b   : > { %v1971_v42 = vmul.f32 1.442695, %v4258_v2  ;;  %v1973_v7 = vmul.f32 1.442695, %v4261_v30 }
 0x36c   : > { %v1895_v5 = vpop.xlane.xlu1 %1894 }
 0x36d   : > { %3122 = vpow2.f32 %v1971_v42  ;;  %v4266_v26 = vsub.f32 %v4138_v40, %v1895_v5  ;;  %v4269_v57 = vsub.f32 %v4141_v41, %v1895_v5 }
 0x36e   : > { %3124 = vpow2.f32 %v1973_v7 }
 0x36f   : > { %v1975_v61 = vmul.f32 1.442695, %v4266_v26  ;;  %v1977_v29 = vmul.f32 1.442695, %v4269_v57 }
 0x370   : > { %v1898_v22 = vpop.xlane.xlu0 %1897 }
 0x371   : > { %3126 = vpow2.f32 %v1975_v61  ;;  %v4274_v52 = vsub.f32 %v4146_v6, %v1898_v22  ;;  %v4277_v13 = vsub.f32 %v4149_v8, %v1898_v22 }
 0x372   : > { %3128 = vpow2.f32 %v1977_v29 }
 0x373   : > { %v3119_v16 = vpop.eup %3118  ;;  %v1979_v40 = vmul.f32 1.442695, %v4274_v52  ;;  %v1981_v41 = vmul.f32 1.442695, %v4277_v13 }
 0x374   : > { %v3121_v53 = vpop.eup %3120  ;;  %v1901_v58 = vpop.xlane.xlu1 %1900 }
 0x375   : > { %3130 = vpow2.f32 %v1979_v40  ;;  %v4282_v18 = vsub.f32 %v4154_v11, %v1901_v58  ;;  %v4285_v55 = vsub.f32 %v4157_v46, %v1901_v58  ;;  %v2031_v6 = vadd.f32 %v3121_v53, %v3119_v16 }
 0x376   : > { %3132 = vpow2.f32 %v1981_v41 }
 0x377   : > { %v3123_v56 = vpop.eup %3122  ;;  %v1983_v8 = vmul.f32 1.442695, %v4282_v18  ;;  %v1985_v23 = vmul.f32 1.442695, %v4285_v55  ;;  %2032 = vadd.xlane.f32.xlu1 %v2031_v6 }
 0x378   : > { %v3125_v24 = vpop.eup %3124  ;;  %v1904_v60 = vpop.xlane.xlu0 %1903 }
 0x379   : > { %3134 = vpow2.f32 %v1983_v8  ;;  %v4290_v47 = vsub.f32 %v4162_v25, %v1904_v60  ;;  %v4293_v11 = vsub.f32 %v4165_v28, %v1904_v60  ;;  %v2034_v63 = vadd.f32 %v3125_v24, %v3123_v56 }
 0x37a   : > { %3136 = vpow2.f32 %v1985_v23 }
 0x37b   : > { %v3127_v46 = vpop.eup %3126  ;;  %v1987_v9 = vmul.f32 1.442695, %v4290_v47  ;;  %v1989_v31 = vmul.f32 1.442695, %v4293_v11  ;;  %2035 = vadd.xlane.f32.xlu0 %v2034_v63 }
 0x37c   : > { %v3129_v12 = vpop.eup %3128  ;;  %v1907_v10 = vpop.xlane.xlu1 %1906 }
 0x37d   : > { %3138 = vpow2.f32 %v1987_v9  ;;  %v4298_v54 = vsub.f32 %v4170_v15, %v1907_v10  ;;  %v4301_v25 = vsub.f32 %v4173_v32, %v1907_v10  ;;  %v2037_v20 = vadd.f32 %v3129_v12, %v3127_v46 }
 0x37e   : > { %3140 = vpow2.f32 %v1989_v31 }
 0x37f   : > { %v3131_v28 = vpop.eup %3130  ;;  %v1991_v21 = vmul.f32 1.442695, %v4298_v54  ;;  %v1993_v37 = vmul.f32 1.442695, %v4301_v25  ;;  %2038 = vadd.xlane.f32.xlu1 %v2037_v20 }
 0x380   : > { %v3133_v35 = vpop.eup %3132  ;;  %v1910_v14 = vpop.xlane.xlu0 %1909 }
 0x381   : > { %3142 = vpow2.f32 %v1991_v21  ;;  %v4306_v50 = vsub.f32 %v4178_v36, %v1910_v14  ;;  %v4309_v15 = vsub.f32 %v4181_v38, %v1910_v14  ;;  %v2040_v42 = vadd.f32 %v3133_v35, %v3131_v28 }
 0x382   : > { %3144 = vpow2.f32 %v1993_v37 }
 0x383   : > { %v3135_v32 = vpop.eup %3134  ;;  %v1995_v7 = vmul.f32 1.442695, %v4306_v50  ;;  %v1997_v5 = vmul.f32 1.442695, %v4309_v15  ;;  %2041 = vadd.xlane.f32.xlu0 %v2040_v42 }
 0x384   : > { %v3137_v61 = vpop.eup %3136  ;;  %v1913_v29 = vpop.xlane.xlu1 %1912 }
 0x385   : > { %3146 = vpow2.f32 %v1995_v7  ;;  %v4314_v22 = vsub.f32 %v4186_v43, %v1913_v29  ;;  %v4317_v36 = vsub.f32 %v4189_v0, %v1913_v29  ;;  %v2043_v16 = vadd.f32 %v3137_v61, %v3135_v32 }
 0x386   : > { %3148 = vpow2.f32 %v1997_v5 }
 0x387   : > { %v3139_v38 = vpop.eup %3138  ;;  %v1999_v40 = vmul.f32 1.442695, %v4314_v22  ;;  %v2001_v41 = vmul.f32 1.442695, %v4317_v36  ;;  %2044 = vadd.xlane.f32.xlu1 %v2043_v16 }
 0x388   : > { %v3141_v53 = vpop.eup %3140  ;;  %v1916_v58 = vpop.xlane.xlu0 %1915 }
 0x389   : > { %3150 = vpow2.f32 %v1999_v40  ;;  %v4322_v6 = vsub.f32 %v4194_v45, %v1916_v58  ;;  %v4325_v43 = vsub.f32 %v4197_v39, %v1916_v58  ;;  %v2046_v56 = vadd.f32 %v3141_v53, %v3139_v38 }
 0x38a   : > { %3152 = vpow2.f32 %v2001_v41 }
 0x38b   : > { %v3143_v0 = vpop.eup %3142  ;;  %v2003_v8 = vmul.f32 1.442695, %v4322_v6  ;;  %v2005_v23 = vmul.f32 1.442695, %v4325_v43  ;;  %2047 = vadd.xlane.f32.xlu0 %v2046_v56 }
 0x38c   : > { %v3145_v24 = vpop.eup %3144  ;;  %v1919_v60 = vpop.xlane.xlu1 %1918 }
 0x38d   : > { %3154 = vpow2.f32 %v2003_v8  ;;  %v4330_v63 = vsub.f32 %v4202_v19, %v1919_v60  ;;  %v4333_v45 = vsub.f32 %v4205_v48, %v1919_v60  ;;  %v2049_v46 = vadd.f32 %v3145_v24, %v3143_v0 }
 0x38e   : > { %3156 = vpow2.f32 %v2005_v23 }
 0x38f   : > { %v3147_v39 = vpop.eup %3146  ;;  %v2007_v9 = vmul.f32 1.442695, %v4330_v63  ;;  %v2009_v31 = vmul.f32 1.442695, %v4333_v45  ;;  %2050 = vadd.xlane.f32.xlu1 %v2049_v46 }
 0x390   : > { %v3149_v12 = vpop.eup %3148  ;;  %v1922_v10 = vpop.xlane.xlu0 %1921 }
 0x391   : > { %3158 = vpow2.f32 %v2007_v9  ;;  %v4338_v20 = vsub.f32 %v4210_v44, %v1922_v10  ;;  %v4341_v19 = vsub.f32 %v4213_v34, %v1922_v10  ;;  %v2052_v28 = vadd.f32 %v3149_v12, %v3147_v39 }
 0x392   : > { %3160 = vpow2.f32 %v2009_v31 }
 0x393   : > { %v3151_v48 = vpop.eup %3150  ;;  %v2011_v21 = vmul.f32 1.442695, %v4338_v20  ;;  %v2013_v37 = vmul.f32 1.442695, %v4341_v19  ;;  %2053 = vadd.xlane.f32.xlu0 %v2052_v28 }
 0x394   : > { %v3153_v35 = vpop.eup %3152  ;;  %v1925_v14 = vpop.xlane.xlu1 %1924 }
 0x395   : > { %3162 = vpow2.f32 %v2011_v21  ;;  %v4346_v42 = vsub.f32 %v4218_v4, %v1925_v14  ;;  %v4349_v44 = vsub.f32 %v4221_v1, %v1925_v14  ;;  %v2055_v32 = vadd.f32 %v3153_v35, %v3151_v48 }
 0x396   : > { %3164 = vpow2.f32 %v2013_v37 }
 0x397   : > { %v3155_v34 = vpop.eup %3154  ;;  %v2015_v7 = vmul.f32 1.442695, %v4346_v42  ;;  %v2017_v5 = vmul.f32 1.442695, %v4349_v44  ;;  %2056 = vadd.xlane.f32.xlu1 %v2055_v32 }
 0x398   : > { %v3157_v61 = vpop.eup %3156 }
 0x399   : > { %3166 = vpow2.f32 %v2015_v7  ;;  %v1928_v29 = vpop.xlane.xlu0 %1927  ;;  %v2058_v16 = vadd.f32 %v3157_v61, %v3155_v34 }
 0x39a   : > { %3168 = vpow2.f32 %v2017_v5  ;;  %v4354_v38 = vsub.f32 %v4226_v51, %v1928_v29  ;;  %v4357_v4 = vsub.f32 %v4229_v59, %v1928_v29 }
 0x39b   : > { %v3159_v1 = vpop.eup %3158  ;;  %2059 = vadd.xlane.f32.xlu0 %v2058_v16 }
 0x39c   : > { %v3161_v40 = vpop.eup %3160  ;;  %v2019_v41 = vmul.f32 1.442695, %v4354_v38  ;;  %v2021_v53 = vmul.f32 1.442695, %v4357_v4 }
 0x39d   : > { %v1931_v58 = vpop.xlane.xlu1 %1930  ;;  %v2061_v56 = vadd.f32 %v3161_v40, %v3159_v1 }
 0x39e   : > { %3170 = vpow2.f32 %v2019_v41  ;;  %v4362_v0 = vsub.f32 %v4234_v3, %v1931_v58  ;;  %v4365_v8 = vsub.f32 %v4237_v33, %v1931_v58 }
 0x39f   : > { %v3163_v51 = vpop.eup %3162  ;;  %3172 = vpow2.f32 %v2021_v53  ;;  %2062 = vadd.xlane.f32.xlu1 %v2061_v56 }
 0x3a0   : > { %v3165_v59 = vpop.eup %3164  ;;  %v2023_v23 = vmul.f32 1.442695, %v4362_v0  ;;  %v2025_v24 = vmul.f32 1.442695, %v4365_v8 }
 0x3a1   : > { %v2064_v60 = vadd.f32 %v3165_v59, %v3163_v51 }
 0x3a2   : > { %3174 = vpow2.f32 %v2023_v23 }
 0x3a3   : > { %v3167_v46 = vpop.eup %3166  ;;  %3176 = vpow2.f32 %v2025_v24  ;;  %2065 = vadd.xlane.f32.xlu0 %v2064_v60 }
 0x3a4   : > { %v3169_v39 = vpop.eup %3168  ;;  %v1934_v9 = vpop.xlane.xlu0 %1933 }
 0x3a5   : > { %v4370_v3 = vsub.f32 %v4242_v17, %v1934_v9  ;;  %v4373_v33 = vsub.f32 %v4245_v27, %v1934_v9  ;;  %v2067_v31 = vadd.f32 %v3169_v39, %v3167_v46 }
 0x3a7   : > { %v2027_v12 = vmul.f32 1.442695, %v4370_v3  ;;  %v2029_v10 = vmul.f32 1.442695, %v4373_v33  ;;  %2068 = vadd.xlane.f32.xlu1 %v2067_v31 }
 0x3a8   : > { %v3171_v28 = vpop.eup %3170 }
 0x3a9   : > { %v3173_v48 = vpop.eup %3172  ;;  %3178 = vpow2.f32 %v2027_v12 }
 0x3aa   : > { %3180 = vpow2.f32 %v2029_v10  ;;  %v2070_v21 = vadd.f32 %v3173_v48, %v3171_v28 }
 0x3ac   : > { %v3175_v37 = vpop.eup %3174  ;;  %2071 = vadd.xlane.f32.xlu0 %v2070_v21 }
 0x3ad   : > { %v3177_v17 = vpop.eup %3176 }
 0x3ae   : > { %v2073_v35 = vadd.f32 %v3177_v17, %v3175_v37 }
 0x3b0   : > { %2074 = vadd.xlane.f32.xlu1 %v2073_v35 }
 0x3b3   : > { %v3179_v27 = vpop.eup %3178 }
 0x3b4   : > { %v3181_v14 = vpop.eup %3180 }
 0x3b5   : > { %v2076_v32 = vadd.f32 %v3181_v14, %v3179_v27 }
 0x3b7   : > { %2077 = vadd.xlane.f32.xlu0 %v2076_v32 }
 0x404   : > { %v2033_v34 = vpop.xlane.xlu1 %2032 }
 0x405   : > { %3182 = vlog2.f32 %v2033_v34 }
 0x408   : > { %v2036_v7 = vpop.xlane.xlu0 %2035 }
 0x409   : > { %3184 = vlog2.f32 %v2036_v7 }
 0x40c   : > { %v2039_v5 = vpop.xlane.xlu1 %2038 }
 0x40d   : > { %3186 = vlog2.f32 %v2039_v5 }
 0x40f   : > { %v3183_v61 = vpop.eup %3182 }
 0x410   : > { %v2080_v29 = vmul.f32 0.6931472, %v3183_v61  ;;  %v2042_v16 = vpop.xlane.xlu0 %2041 }
 0x411   : > { %3188 = vlog2.f32 %v2042_v16 }
 0x412   : > { %v2111_v1 = vsub.f32 %v4250_v62, %v2080_v29  ;;  %v2112_v40 = vsub.f32 %v4253_v49, %v2080_v29 }
 0x413   : > { %v3185_v41 = vpop.eup %3184 }
 0x414   : > { %2143 = vst [vmem:[%s4382_s16] sm:$0xff] %v2111_v1  ;;  %2144 = vst [vmem:[%s4382_s16 + $0x8] sm:$0xff] %v2112_v40  ;;  %v2082_v53 = vmul.f32 0.6931472, %v3185_v41  ;;  %v2045_v58 = vpop.xlane.xlu1 %2044 }
 0x415   : > { %3190 = vlog2.f32 %v2045_v58 }
 0x416   : > { %v2113_v56 = vsub.f32 %v4258_v2, %v2082_v53  ;;  %v2114_v62 = vsub.f32 %v4261_v30, %v2082_v53 }
 0x417   : > { %v3187_v51 = vpop.eup %3186 }
 0x418   : > { %2145 = vst [vmem:[%s4382_s16 + $0x10] sm:$0xff] %v2113_v56  ;;  %2146 = vst [vmem:[%s4382_s16 + $0x18] sm:$0xff] %v2114_v62  ;;  %v2084_v49 = vmul.f32 0.6931472, %v3187_v51  ;;  %v2048_v59 = vpop.xlane.xlu0 %2047 }
 0x419   : > { %3192 = vlog2.f32 %v2048_v59 }
 0x41a   : > { %v2115_v23 = vsub.f32 %v4266_v26, %v2084_v49  ;;  %v2116_v24 = vsub.f32 %v4269_v57, %v2084_v49 }
 0x41b   : > { %v3189_v60 = vpop.eup %3188 }
 0x41c   : > { %2147 = vst [vmem:[%s4382_s16 + $0x20] sm:$0xff] %v2115_v23  ;;  %2148 = vst [vmem:[%s4382_s16 + $0x28] sm:$0xff] %v2116_v24  ;;  %v2086_v2 = vmul.f32 0.6931472, %v3189_v60  ;;  %v2051_v46 = vpop.xlane.xlu1 %2050 }
 0x41d   : > { %3194 = vlog2.f32 %v2051_v46 }
 0x41e   : > { %v2117_v30 = vsub.f32 %v4274_v52, %v2086_v2  ;;  %v2118_v39 = vsub.f32 %v4277_v13, %v2086_v2 }
 0x41f   : > { %v3191_v9 = vpop.eup %3190 }
 0x420   : > { %2149 = vst [vmem:[%s4382_s16 + $0x30] sm:$0xff] %v2117_v30  ;;  %2150 = vst [vmem:[%s4382_s16 + $0x38] sm:$0xff] %v2118_v39  ;;  %v2088_v26 = vmul.f32 0.6931472, %v3191_v9  ;;  %v2054_v31 = vpop.xlane.xlu0 %2053 }
 0x421   : > { %3196 = vlog2.f32 %v2054_v31 }
 0x422   : > { %v2119_v57 = vsub.f32 %v4282_v18, %v2088_v26  ;;  %v2120_v12 = vsub.f32 %v4285_v55, %v2088_v26 }
 0x423   : > { %v3193_v10 = vpop.eup %3192 }
 0x424   : > { %2151 = vst [vmem:[%s4382_s16 + $0x40] sm:$0xff] %v2119_v57  ;;  %2152 = vst [vmem:[%s4382_s16 + $0x48] sm:$0xff] %v2120_v12  ;;  %v2090_v52 = vmul.f32 0.6931472, %v3193_v10  ;;  %v2057_v28 = vpop.xlane.xlu1 %2056 }
 0x425   : > { %3198 = vlog2.f32 %v2057_v28 }
 0x426   : > { %v2121_v13 = vsub.f32 %v4290_v47, %v2090_v52  ;;  %v2122_v48 = vsub.f32 %v4293_v11, %v2090_v52 }
 0x427   : > { %v3195_v21 = vpop.eup %3194 }
 0x428   : > { %2153 = vst [vmem:[%s4382_s16 + $0x50] sm:$0xff] %v2121_v13  ;;  %2154 = vst [vmem:[%s4382_s16 + $0x58] sm:$0xff] %v2122_v48  ;;  %v2092_v18 = vmul.f32 0.6931472, %v3195_v21  ;;  %v2060_v37 = vpop.xlane.xlu0 %2059 }
 0x429   : > { %3200 = vlog2.f32 %v2060_v37 }
 0x42a   : > { %v2123_v55 = vsub.f32 %v4298_v54, %v2092_v18  ;;  %v2124_v17 = vsub.f32 %v4301_v25, %v2092_v18 }
 0x42b   : > { %v3197_v35 = vpop.eup %3196 }
 0x42c   : > { %2155 = vst [vmem:[%s4382_s16 + $0x60] sm:$0xff] %v2123_v55  ;;  %2156 = vst [vmem:[%s4382_s16 + $0x68] sm:$0xff] %v2124_v17  ;;  %v2094_v47 = vmul.f32 0.6931472, %v3197_v35  ;;  %v2063_v27 = vpop.xlane.xlu1 %2062 }
 0x42d   : > { %3202 = vlog2.f32 %v2063_v27 }
 0x42e   : > { %v2125_v11 = vsub.f32 %v4306_v50, %v2094_v47  ;;  %v2126_v14 = vsub.f32 %v4309_v15, %v2094_v47 }
 0x42f   : > { %v3199_v32 = vpop.eup %3198 }
 0x430   : > { %2157 = vst [vmem:[%s4382_s16 + $0x70] sm:$0xff] %v2125_v11  ;;  %2158 = vst [vmem:[%s4382_s16 + $0x78] sm:$0xff] %v2126_v14  ;;  %v2096_v54 = vmul.f32 0.6931472, %v3199_v32  ;;  %v2066_v34 = vpop.xlane.xlu0 %2065 }
 0x431   : > { %3204 = vlog2.f32 %v2066_v34 }
 0x432   : > { %v2127_v25 = vsub.f32 %v4314_v22, %v2096_v54  ;;  %v2128_v7 = vsub.f32 %v4317_v36, %v2096_v54 }
 0x433   : > { %v3201_v5 = vpop.eup %3200 }
 0x434   : > { %2159 = vst [vmem:[%s4382_s16 + $0x80] sm:$0xff] %v2127_v25  ;;  %2160 = vst [vmem:[%s4382_s16 + $0x88] sm:$0xff] %v2128_v7  ;;  %v2098_v50 = vmul.f32 0.6931472, %v3201_v5  ;;  %v2069_v61 = vpop.xlane.xlu1 %2068 }
 0x435   : > { %3206 = vlog2.f32 %v2069_v61 }
 0x436   : > { %v2129_v15 = vsub.f32 %v4322_v6, %v2098_v50  ;;  %v2130_v29 = vsub.f32 %v4325_v43, %v2098_v50 }
 0x437   : > { %v3203_v16 = vpop.eup %3202 }
 0x438   : > { %2161 = vst [vmem:[%s4382_s16 + $0x90] sm:$0xff] %v2129_v15  ;;  %2162 = vst [vmem:[%s4382_s16 + $0x98] sm:$0xff] %v2130_v29  ;;  %v2100_v22 = vmul.f32 0.6931472, %v3203_v16 }
 0x439   : > { %v2072_v1 = vpop.xlane.xlu0 %2071 }
 0x43a   : > { %v2131_v36 = vsub.f32 %v4330_v63, %v2100_v22  ;;  %v2132_v40 = vsub.f32 %v4333_v45, %v2100_v22  ;;  %3208 = vlog2.f32 %v2072_v1 }
 0x43b   : > { %v3205_v41 = vpop.eup %3204 }
 0x43c   : > { %2163 = vst [vmem:[%s4382_s16 + $0xa0] sm:$0xff] %v2131_v36  ;;  %2164 = vst [vmem:[%s4382_s16 + $0xa8] sm:$0xff] %v2132_v40  ;;  %v2102_v6 = vmul.f32 0.6931472, %v3205_v41 }
 0x43d   : > { %v2075_v53 = vpop.xlane.xlu1 %2074 }
 0x43e   : > { %v2133_v43 = vsub.f32 %v4338_v20, %v2102_v6  ;;  %v2134_v58 = vsub.f32 %v4341_v19, %v2102_v6  ;;  %3210 = vlog2.f32 %v2075_v53 }
 0x43f   : > { %v3207_v56 = vpop.eup %3206 }
 0x440   : > { %2165 = vst [vmem:[%s4382_s16 + $0xb0] sm:$0xff] %v2133_v43  ;;  %2166 = vst [vmem:[%s4382_s16 + $0xb8] sm:$0xff] %v2134_v58  ;;  %v2104_v63 = vmul.f32 0.6931472, %v3207_v56 }
 0x442   : > { %v2135_v45 = vsub.f32 %v4346_v42, %v2104_v63  ;;  %v2136_v62 = vsub.f32 %v4349_v44, %v2104_v63 }
 0x444   : > { %v3209_v51 = vpop.eup %3208  ;;  %2167 = vst [vmem:[%s4382_s16 + $0xc0] sm:$0xff] %v2135_v45  ;;  %2168 = vst [vmem:[%s4382_s16 + $0xc8] sm:$0xff] %v2136_v62  ;;  %v2078_v20 = vpop.xlane.xlu0 %2077 }
 0x445   : > { %v2106_v19 = vmul.f32 0.6931472, %v3209_v51  ;;  %3212 = vlog2.f32 %v2078_v20 }
 0x447   : > { %v2137_v49 = vsub.f32 %v4354_v38, %v2106_v19  ;;  %v2138_v59 = vsub.f32 %v4357_v4, %v2106_v19 }
 0x448   : > { %v3211_v23 = vpop.eup %3210 }
 0x449   : > { %2169 = vst [vmem:[%s4382_s16 + $0xd0] sm:$0xff] %v2137_v49  ;;  %2170 = vst [vmem:[%s4382_s16 + $0xd8] sm:$0xff] %v2138_v59  ;;  %v2108_v42 = vmul.f32 0.6931472, %v3211_v23 }
 0x44b   : > { %v2139_v44 = vsub.f32 %v4362_v0, %v2108_v42  ;;  %v2140_v24 = vsub.f32 %v4365_v8, %v2108_v42 }
 0x44d   : > { %2171 = vst [vmem:[%s4382_s16 + $0xe0] sm:$0xff] %v2139_v44  ;;  %2172 = vst [vmem:[%s4382_s16 + $0xe8] sm:$0xff] %v2140_v24 }
 0x44f   : > { %v3213_v60 = vpop.eup %3212 }
 0x450   : > { %v2110_v38 = vmul.f32 0.6931472, %v3213_v60 }
 0x452   : > { %v2141_v4 = vsub.f32 %v4370_v3, %v2110_v38  ;;  %v2142_v0 = vsub.f32 %v4373_v33, %v2110_v38 }
 0x454   : > { %2173 = vst [vmem:[%s4382_s16 + $0xf0] sm:$0xff] %v2141_v4  ;;  %2174 = vst [vmem:[%s4382_s16 + $0xf8] sm:$0xff] %v2142_v0 }
 0x455   : > { %3255 = shalt.err (!%p3252_p7)
}
 0x456   : > { %s3256_s10 = scalar_lea.hbm %s4447_s6, 4096  ;;  %s3260_s13 = scalar_lea.hbm %s4503_s5, 16384 }
 0x457   : > { %p3257_p8 = scmp.ne.s32.totalorder %s4447_s6, %s3256_s10  ;;  %p3261_p1 = scmp.lt.u32.totalorder %s4447_s6, %s4503_s5 }
 0x458   : > { %p3262_p0 = scmp.lt.u32.totalorder %s3260_s13, %s3256_s10  ;;  %p3264_p6 = scmp.lt.u32.totalorder %s3256_s10, %s4447_s6 }
 0x459   : > { %p3258_p11 = pnand %p3257_p8, %p4514_p9 }
 0x45a   : > { %p3263_p5 = por %p3262_p0, %p3261_p1 }
 0x45b   : > { %p3259_p13 = pneg %p3258_p11 }
 0x45c   : > { %p3265_p10 = por %p3264_p6, %p3263_p5 }
 0x45e   : > { %p3266_p12 = pnand %p3265_p10, %p3259_p13 }
 0x460   : > { %3269 = shalt.err (!%p3266_p12)
}
 0x461   : > { %s3320_s16 = smov 256   ;;  %s3321_s17 = smov 16  }
 0x462   : > { %3038 = dma.vmem_to_hbm [thread:$0]  (%p4514_p9), %s4449_s23, 4096, %s4447_s6, %s4457_s22, %s3320_s16, %s3320_s16, %s3321_s17  }
 0x463 PF: > { %p3050_p2 = scmp.ge.s32.totalorder %s3308_s21, 2  ;;  %s2205_s25 = sand.u32 1, %s3296_s18  }
 0x464   : > { %p4515_p3 = scmp.ne.s32.totalorder %s4508_s29, 0  ;;  %s2206_s26 = scalar_lea.sflag [#allocation4], %s2205_s25 }
 0x466   : > { %p3045_p4 = pnand %p3050_p2, %p4515_p3 }
 0x468   : > { %3291 = dma.done.wait (!%p3045_p4), %s2206_s26, 4096  }
 0x469   : > { %3293 = vsyncadd (!%p3045_p4), %s2206_s26, 4294963200  ;;  %p16_p7 = scmp.ge.s32.totalorder %s3377_s24, 6   ;;  %s4516_s18 = smov %s3300_s19 }
 0x46a   : > { %s4517_s19 = smov %s3304_s20  ;;  %s4518_s20 = smov %s3388_s27 }
 0x46b   : > { %s4519_s21 = smov %s3377_s24  ;;  %18 = sbr.rel (!%p16_p7) target bundleno = 4 (0x4), region = 83 }
 0x472   :  { %2211 = vsyncpa [#allocation3], 1 }
 0x473   :  { %2213 = vsyncpa [#allocation3 + $0x1], 1 }
 0x474   :  { %2214 = vsyncpa [#allocation4], 1 }
 0x475   :  { %2216 = vsyncpa [#allocation4 + $0x1], 1 }

</bundles_post_ra>
